<compile_context>
chip_gen: v5e
topology: v5e:2x2
jax: 0.10.0
libtpu: 0.0.40
codegen_flags: <defaults>
</compile_context>

<pallas_src>
import functools
import math

import jax
import jax.numpy as jnp
import numpy as np
from jax import lax
from jax.experimental import pallas as pl
from jax.experimental.pallas import tpu as pltpu

EPS = 1e-6  # nn.LayerNorm(hidden_dim, eps=1e-06)


def _layernorm(z, w, b):
    mu = jnp.mean(z, axis=-1, keepdims=True)
    var = jnp.mean((z - mu) ** 2, axis=-1, keepdims=True)
    return (z - mu) * lax.rsqrt(var + EPS) * w + b


def _gelu(z):
    # TODO(synk): PyTorch nn.GELU default is exact erf-GELU; tanh approximation used here.
    c = jnp.sqrt(2.0 / jnp.pi).astype(z.dtype)
    return 0.5 * z * (1.0 + jnp.tanh(c * (z + 0.044715 * z * z * z)))


def _head_grouping(hidden_dim, num_heads):
    """Group heads so each group's q/k/v/output slab is lane-dense (>=128 wide, aligned)."""
    hd = hidden_dim // num_heads
    if hd >= 128:
        hpg = 1
    else:
        hpg = min(num_heads, max(1, 128 // hd))
        while num_heads % hpg != 0:
            hpg -= 1
    gw = hpg * hd
    return hd, hpg, gw, num_heads // hpg


def encoder_block_kernel(num_heads,
                         x_ref, ln1w, ln1b, wqkv, bqkv, wo, bo, g1,
                         ln2w, ln2b, w1, b1, w2, b2, g2,
                         out_ref, qkv_slab, attn_slab):
    S, D = x_ref.shape
    hd, hpg, gw, num_groups = _head_grouping(D, num_heads)
    bf16, f32 = jnp.bfloat16, jnp.float32

    x = x_ref[...]                                       # (S, D) f32

    # ---- branch 1: LN -> MultiheadAttention -> LayerScale -> + residual ----
    xn = _layernorm(x, ln1w[...], ln1b[...])             # f32 elementwise path

    # Fused QKV projection (bf16 MXU inputs, f32 accumulation), full K=D width.
    # The 1/sqrt(hd) scale is folded into the q columns of wqkv/bqkv on host.
    qkv = jnp.dot(xn.astype(bf16), wqkv[...], preferred_element_type=f32)
    qkv = qkv + bqkv[...]                                # (S, 3D) f32

    # Stage q/k/v per head group into a bf16 VMEM slab.  Each group slab is
    # gw(=128)-lane wide and 128-aligned -> unmasked, lane-dense stores; the
    # group index lives on the leading (untiled) axis so no dynamic lane
    # slicing is needed inside the head loop.
    for g in range(num_groups):                          # static, lightweight
        lo = g * gw
        qkv_slab[3 * g + 0] = qkv[:, lo:lo + gw].astype(bf16)
        qkv_slab[3 * g + 1] = qkv[:, D + lo:D + lo + gw].astype(bf16)
        qkv_slab[3 * g + 2] = qkv[:, 2 * D + lo:2 * D + lo + gw].astype(bf16)

    def head_group(g, carry):
        qg = qkv_slab[3 * g + 0]                         # (S, gw) bf16
        kg = qkv_slab[3 * g + 1]
        vg = qkv_slab[3 * g + 2]
        outs = []
        for i in range(hpg):                             # small static inner loop
            qh = qg[:, i * hd:(i + 1) * hd]
            kh = kg[:, i * hd:(i + 1) * hd]
            vh = vg[:, i * hd:(i + 1) * hd]
            s = lax.dot_general(qh, kh, (((1,), (1,)), ((), ())),
                                preferred_element_type=f32)      # (S, S) f32
            s = s - jnp.max(s, axis=-1, keepdims=True)            # f32 softmax
            p = jnp.exp(s)
            p = p * pl.reciprocal(jnp.sum(p, axis=-1, keepdims=True), approx=True)
            outs.append(jnp.dot(p.astype(bf16), vh,
                                preferred_element_type=f32).astype(bf16))
        attn_slab[g] = outs[0] if hpg == 1 else jnp.concatenate(outs, axis=1)
        return carry

    # fori_loop bounds live ranges of the (S,S) score buffers for large S /
    # many heads; fully unroll only when S is small.
    lax.fori_loop(0, num_groups, head_group, 0, unroll=bool(S <= 128))

    # Out-projection stays a single K=D matmul over the completed slab.
    if num_groups == 1:
        attn_in = attn_slab[0]
    else:
        attn_in = jnp.concatenate([attn_slab[g] for g in range(num_groups)], axis=1)
    attn = jnp.dot(attn_in, wo[...], preferred_element_type=f32) + bo[...]
    y1 = attn * g1[...] + x                              # layer_scale_1 + residual

    # ---- branch 2: LN -> MLP (Linear / GELU / Linear) -> LayerScale -> + residual
    yn = _layernorm(y1, ln2w[...], ln2b[...])
    h1 = jnp.dot(yn.astype(bf16), w1[...], preferred_element_type=f32) + b1[...]
    h1 = _gelu(h1)                                       # f32 (keep v5e-safe)
    h2 = jnp.dot(h1.astype(bf16), w2[...], preferred_element_type=f32) + b2[...]
    out_ref[...] = (h2 * g2[...] + y1).astype(out_ref.dtype)


_WEIGHT_NAMES = ["ln1w", "ln1b", "wqkv", "bqkv", "wo", "bo", "g1",
                 "ln2w", "ln2b", "w1", "b1", "w2", "b2", "g2"]


def _const_spec(a):
    # Full-array block, constant index map (weights stay resident in VMEM).
    # Single-buffered: they are never re-fetched, so the default double buffer
    # would only waste VMEM (halves resident weight footprint on v7x).
    zeros = (0,) * a.ndim
    idx = lambda b, zeros=zeros: zeros
    try:
        return pl.BlockSpec(a.shape, idx, pipeline_mode=pl.Buffered(1))
    except TypeError:  # older BlockSpec signature without pipeline_mode
        return pl.BlockSpec(a.shape, idx)


def _vmem_limit_bytes(weights, x, num_heads):
    _, S, D = x.shape
    try:
        cap = int(pltpu.get_tpu_info().vmem_capacity_bytes)
    except Exception:
        cap = 128 * 1024 * 1024
    # Leave headroom for Mosaic internal scratch: ~52 MiB on v7x (64 MiB/TC),
    # 96 MiB on v5e/v6e (128 MiB).
    hard_cap = min(96 * 1024 * 1024, (cap * 13) // 16)
    wbytes = sum(int(w.size) * w.dtype.itemsize for w in weights)   # single-buffered
    io_bytes = 2 * 2 * S * D * x.dtype.itemsize                      # double-buffered x/out
    _, hpg, _, _ = _head_grouping(D, num_heads)
    act_bytes = (4 * S * (3 * D + 4 * D + 4 * D)   # f32 qkv, mlp hidden, (S,D) temps
                 + 2 * S * (3 * D + D)             # bf16 qkv / attn slabs
                 + 4 * 2 * hpg * S * S)            # ~2 head-groups of live f32 scores
    need = wbytes + io_bytes + act_bytes + (2 << 20)
    return int(min(hard_cap, max(32 * 1024 * 1024, need)))


def encoder_block(x, params, num_heads):
    B, S, D = x.shape
    assert D % num_heads == 0
    weights = [params[n] for n in _WEIGHT_NAMES]
    _, _, gw, num_groups = _head_grouping(D, num_heads)

    kernel = functools.partial(encoder_block_kernel, num_heads)
    # TODO(synk): for v7x (2 TCs, 64 MiB VMEM) at ViT-L shapes, add a query-tile
    # grid axis (flash-style m/l/acc carry) so both TensorCores get work when B
    # is 1/odd and activations fit VMEM; untiled S is fine on v5e/v6e.
    return pl.pallas_call(
        kernel,
        out_shape=jax.ShapeDtypeStruct((B, S, D), x.dtype),
        grid=(B,),
        in_specs=[pl.BlockSpec((None, S, D), lambda b: (b, 0, 0))]
                 + [_const_spec(w) for w in weights],
        out_specs=pl.BlockSpec((None, S, D), lambda b: (b, 0, 0)),
        scratch_shapes=[pltpu.VMEM((3 * num_groups, S, gw), jnp.bfloat16),  # q/k/v per group
                        pltpu.VMEM((num_groups, S, gw), jnp.bfloat16)],     # attn out per group
        compiler_params=pltpu.CompilerParams(
            dimension_semantics=("parallel",),
            vmem_limit_bytes=_vmem_limit_bytes(weights, x, num_heads)),
    )(x, *weights)


def encoder_block_ref(x, p, num_heads):
    """Plain-JAX reference using the same bf16-matmul / f32-accumulate math."""
    B, S, D = x.shape
    H = num_heads
    hd = D // H
    bf16, f32 = jnp.bfloat16, jnp.float32

    def ln(z, w, b):
        mu = z.mean(-1, keepdims=True)
        var = ((z - mu) ** 2).mean(-1, keepdims=True)
        return (z - mu) / jnp.sqrt(var + EPS) * w + b

    def mm(a, b):
        return lax.dot_general(a.astype(bf16), b.astype(bf16),
                               (((a.ndim - 1,), (0,)), ((), ())),
                               preferred_element_type=f32)

    xn = ln(x, p["ln1w"], p["ln1b"])
    qkv = mm(xn, p["wqkv"]) + p["bqkv"]
    q, k, v = qkv[..., :D], qkv[..., D:2 * D], qkv[..., 2 * D:]
    qh = q.reshape(B, S, H, hd).transpose(0, 2, 1, 3).astype(bf16)
    kh = k.reshape(B, S, H, hd).transpose(0, 2, 1, 3).astype(bf16)
    vh = v.reshape(B, S, H, hd).transpose(0, 2, 1, 3).astype(bf16)
    s = jnp.einsum("bhqd,bhkd->bhqk", qh, kh, preferred_element_type=f32)
    s = s - s.max(-1, keepdims=True)
    pr = jnp.exp(s)
    pr = pr / pr.sum(-1, keepdims=True)
    o = jnp.einsum("bhqk,bhkd->bhqd", pr.astype(bf16), vh,
                   preferred_element_type=f32)
    o = o.transpose(0, 2, 1, 3).reshape(B, S, D)
    attn = mm(o, p["wo"]) + p["bo"]
    y1 = attn * p["g1"] + x

    yn = ln(y1, p["ln2w"], p["ln2b"])
    h1 = _gelu(mm(yn, p["w1"]) + p["b1"])
    h2 = mm(h1, p["w2"]) + p["b2"]
    return h2 * p["g2"] + y1


if __name__ == "__main__":
    # Small but lane-dense shapes (D multiple of 128, MLP = 4 * D).
    B, S, D, H = 2, 16, 128, 4
    MLP = 4 * D
    layer_scale_init = 0.1

    key = jax.random.PRNGKey(0)
    ks = jax.random.split(key, 16)

    def rnd(k, shape, scale=0.05):
        return jax.random.normal(k, shape, jnp.float32) * scale

    # PyTorch-shaped parameters (Linear weights are (out, in)).
    in_proj_w = rnd(ks[0], (3 * D, D))      # nn.MultiheadAttention in_proj_weight
    in_proj_b = rnd(ks[1], (3 * D,))
    out_w = rnd(ks[2], (D, D))              # out_proj
    out_b = rnd(ks[3], (D,))
    fc1_w = rnd(ks[4], (MLP, D))            # MLP linear 1
    fc1_b = rnd(ks[5], (MLP,))
    fc2_w = rnd(ks[6], (D, MLP))            # MLP linear 2
    fc2_b = rnd(ks[7], (D,))
    ln1_w = 1.0 + rnd(ks[8], (D,))
    ln1_b = rnd(ks[9], (D,))
    ln2_w = 1.0 + rnd(ks[10], (D,))
    ln2_b = rnd(ks[11], (D,))

    # Kernel-side params:
    #   * Linear weights pre-transposed to (in, out) and cast to bf16.
    #   * Q/K/V fused into one (D, 3D) weight; softmax scale 1/sqrt(hd) folded
    #     into the q columns (weight AND bias).
    #   * biases / LayerNorm / layer-scale kept f32, reshaped to (1, dim) for
    #     lane-major broadcasting.
    scale = 1.0 / math.sqrt(D // H)
    wq = in_proj_w[:D].T * scale
    wk = in_proj_w[D:2 * D].T
    wv = in_proj_w[2 * D:].T
    bq = in_proj_b[:D] * scale
    bk = in_proj_b[D:2 * D]
    bv = in_proj_b[2 * D:]
    params = {
        "ln1w": ln1_w.reshape(1, D), "ln1b": ln1_b.reshape(1, D),
        "wqkv": jnp.concatenate([wq, wk, wv], axis=1).astype(jnp.bfloat16),
        "bqkv": jnp.concatenate([bq, bk, bv]).reshape(1, 3 * D),
        "wo": out_w.T.astype(jnp.bfloat16), "bo": out_b.reshape(1, D),
        "g1": (layer_scale_init * jnp.ones((D,), jnp.float32)).reshape(1, D),
        "ln2w": ln2_w.reshape(1, D), "ln2b": ln2_b.reshape(1, D),
        "w1": fc1_w.T.astype(jnp.bfloat16), "b1": fc1_b.reshape(1, MLP),
        "w2": fc2_w.T.astype(jnp.bfloat16), "b2": fc2_b.reshape(1, D),
        "g2": (layer_scale_init * jnp.ones((D,), jnp.float32)).reshape(1, D),
    }

    x = jax.random.normal(ks[12], (B, S, D), jnp.float32)

    out = encoder_block(x, params, H)
    out = jax.block_until_ready(out)

    ref = encoder_block_ref(x, params, H)
    assert out.shape == (B, S, D)
    max_err = float(np.max(np.abs(np.asarray(out) - np.asarray(ref))))
    assert np.allclose(np.asarray(out), np.asarray(ref),
                       rtol=5e-3, atol=5e-3), f"max_err={max_err}"

    print("KERNEL_OK")
</pallas_src>

<mosaic_0001>
module attributes {stable_mosaic.version = 11 : i64} {
  func.func @encoder_block_kernel(%arg0: i32, %arg1: memref<1x16x128xf32, #tpu.memory_space<vmem>>, %arg2: memref<1x128xf32, #tpu.memory_space<vmem>>, %arg3: memref<1x128xf32, #tpu.memory_space<vmem>>, %arg4: memref<128x384xbf16, #tpu.memory_space<vmem>>, %arg5: memref<1x384xf32, #tpu.memory_space<vmem>>, %arg6: memref<128x128xbf16, #tpu.memory_space<vmem>>, %arg7: memref<1x128xf32, #tpu.memory_space<vmem>>, %arg8: memref<1x128xf32, #tpu.memory_space<vmem>>, %arg9: memref<1x128xf32, #tpu.memory_space<vmem>>, %arg10: memref<1x128xf32, #tpu.memory_space<vmem>>, %arg11: memref<128x512xbf16, #tpu.memory_space<vmem>>, %arg12: memref<1x512xf32, #tpu.memory_space<vmem>>, %arg13: memref<512x128xbf16, #tpu.memory_space<vmem>>, %arg14: memref<1x128xf32, #tpu.memory_space<vmem>>, %arg15: memref<1x128xf32, #tpu.memory_space<vmem>>, %arg16: memref<1x16x128xf32, #tpu.memory_space<vmem>>, %arg17: memref<3x16x128xbf16, #tpu.memory_space<vmem>>, %arg18: memref<1x16x128xbf16, #tpu.memory_space<vmem>>) attributes {dimension_semantics = [#tpu.dimension_semantics<parallel>], iteration_bounds = array<i64: 2>, scalar_prefetch = 0 : i64, scratch_operands = 2 : i64, tpu.core_type = #tpu.core_type<tc>, window_params = [{transform_indices = @transform_0, window_bounds = array<i64: 1, 16, 128>}, {pipeline_mode = #tpu.pipeline_mode<synchronous>, transform_indices = @transform_1, window_bounds = array<i64: 1, 128>}, {pipeline_mode = #tpu.pipeline_mode<synchronous>, transform_indices = @transform_2, window_bounds = array<i64: 1, 128>}, {pipeline_mode = #tpu.pipeline_mode<synchronous>, transform_indices = @transform_3, window_bounds = array<i64: 128, 384>}, {pipeline_mode = #tpu.pipeline_mode<synchronous>, transform_indices = @transform_4, window_bounds = array<i64: 1, 384>}, {pipeline_mode = #tpu.pipeline_mode<synchronous>, transform_indices = @transform_5, window_bounds = array<i64: 128, 128>}, {pipeline_mode = #tpu.pipeline_mode<synchronous>, transform_indices = @transform_6, window_bounds = array<i64: 1, 128>}, {pipeline_mode = #tpu.pipeline_mode<synchronous>, transform_indices = @transform_7, window_bounds = array<i64: 1, 128>}, {pipeline_mode = #tpu.pipeline_mode<synchronous>, transform_indices = @transform_8, window_bounds = array<i64: 1, 128>}, {pipeline_mode = #tpu.pipeline_mode<synchronous>, transform_indices = @transform_9, window_bounds = array<i64: 1, 128>}, {pipeline_mode = #tpu.pipeline_mode<synchronous>, transform_indices = @transform_10, window_bounds = array<i64: 128, 512>}, {pipeline_mode = #tpu.pipeline_mode<synchronous>, transform_indices = @transform_11, window_bounds = array<i64: 1, 512>}, {pipeline_mode = #tpu.pipeline_mode<synchronous>, transform_indices = @transform_12, window_bounds = array<i64: 512, 128>}, {pipeline_mode = #tpu.pipeline_mode<synchronous>, transform_indices = @transform_13, window_bounds = array<i64: 1, 128>}, {pipeline_mode = #tpu.pipeline_mode<synchronous>, transform_indices = @transform_14, window_bounds = array<i64: 1, 128>}, {transform_indices = @transform_15, window_bounds = array<i64: 1, 16, 128>}]} {
    %c0 = arith.constant 0 : index
    %c0_0 = arith.constant 0 : index
    %c0_1 = arith.constant 0 : index
    %0 = vector.load %arg1[%c0, %c0_0, %c0_1] : memref<1x16x128xf32, #tpu.memory_space<vmem>>, vector<1x16x128xf32>
    %1 = vector.shape_cast %0 : vector<1x16x128xf32> to vector<16x128xf32>
    %c0_2 = arith.constant 0 : index
    %c0_3 = arith.constant 0 : index
    %2 = vector.load %arg2[%c0_2, %c0_3] : memref<1x128xf32, #tpu.memory_space<vmem>>, vector<1x128xf32>
    %c0_4 = arith.constant 0 : index
    %c0_5 = arith.constant 0 : index
    %3 = vector.load %arg3[%c0_4, %c0_5] : memref<1x128xf32, #tpu.memory_space<vmem>>, vector<1x128xf32>
    %cst = arith.constant dense<0.000000e+00> : vector<16xf32>
    %4 = vector.multi_reduction <add>, %1, %cst [1] : vector<16x128xf32> to vector<16xf32>
    %5 = vector.shape_cast %4 : vector<16xf32> to vector<16x1xf32>
    %cst_6 = arith.constant 1.280000e+02 : f32
    %6 = vector.broadcast %cst_6 : f32 to vector<16x1xf32>
    %7 = arith.divf %5, %6 : vector<16x1xf32>
    %8 = vector.broadcast %7 : vector<16x1xf32> to vector<16x128xf32>
    %9 = arith.subf %1, %8 : vector<16x128xf32>
    %10 = arith.mulf %9, %9 : vector<16x128xf32>
    %cst_7 = arith.constant dense<0.000000e+00> : vector<16xf32>
    %11 = vector.multi_reduction <add>, %10, %cst_7 [1] : vector<16x128xf32> to vector<16xf32>
    %12 = vector.shape_cast %11 : vector<16xf32> to vector<16x1xf32>
    %cst_8 = arith.constant 1.280000e+02 : f32
    %13 = vector.broadcast %cst_8 : f32 to vector<16x1xf32>
    %14 = arith.divf %12, %13 : vector<16x1xf32>
    %15 = vector.broadcast %7 : vector<16x1xf32> to vector<16x128xf32>
    %16 = arith.subf %1, %15 : vector<16x128xf32>
    %cst_9 = arith.constant 9.99999997E-7 : f32
    %17 = vector.broadcast %cst_9 : f32 to vector<16x1xf32>
    %18 = arith.addf %14, %17 : vector<16x1xf32>
    %19 = math.rsqrt %18 : vector<16x1xf32>
    %20 = vector.broadcast %19 : vector<16x1xf32> to vector<16x128xf32>
    %21 = arith.mulf %16, %20 : vector<16x128xf32>
    %22 = vector.broadcast %2 : vector<1x128xf32> to vector<16x128xf32>
    %23 = arith.mulf %21, %22 : vector<16x128xf32>
    %24 = vector.broadcast %3 : vector<1x128xf32> to vector<16x128xf32>
    %25 = arith.addf %23, %24 : vector<16x128xf32>
    %26 = arith.truncf %25 : vector<16x128xf32> to vector<16x128xbf16>
    %c0_10 = arith.constant 0 : index
    %c0_11 = arith.constant 0 : index
    %27 = vector.load %arg4[%c0_10, %c0_11] : memref<128x384xbf16, #tpu.memory_space<vmem>>, vector<128x384xbf16>
    %cst_12 = arith.constant dense<0.000000e+00> : vector<16x384xf32>
    %28 = tpu.matmul %26, %27, %cst_12 {dimension_numbers = #tpu.dot_dimension_numbers<[1], [0], [0], [1], [0, 0, 1, 1], [], []>} : vector<16x128xbf16>, vector<128x384xbf16>, vector<16x384xf32> -> vector<16x384xf32>
    %c0_13 = arith.constant 0 : index
    %c0_14 = arith.constant 0 : index
    %29 = vector.load %arg5[%c0_13, %c0_14] : memref<1x384xf32, #tpu.memory_space<vmem>>, vector<1x384xf32>
    %30 = vector.broadcast %29 : vector<1x384xf32> to vector<16x384xf32>
    %31 = arith.addf %28, %30 : vector<16x384xf32>
    %32 = vector.extract_strided_slice %31 {offsets = [0, 0], sizes = [16, 128], strides = [1, 1]} : vector<16x384xf32> to vector<16x128xf32>
    %33 = arith.truncf %32 : vector<16x128xf32> to vector<16x128xbf16>
    %c0_15 = arith.constant 0 : index
    %c0_16 = arith.constant 0 : index
    %c0_17 = arith.constant 0 : index
    %34 = vector.load %arg17[%c0_15, %c0_16, %c0_17] : memref<3x16x128xbf16, #tpu.memory_space<vmem>>, vector<1x16x128xbf16>
    %35 = vector.shape_cast %34 : vector<1x16x128xbf16> to vector<16x128xbf16>
    %36 = vector.shape_cast %33 : vector<16x128xbf16> to vector<1x16x128xbf16>
    tpu.vector_store %arg17[%c0_15, %c0_16, %c0_17], %36 {strides = array<i32>} : memref<3x16x128xbf16, #tpu.memory_space<vmem>>, vector<1x16x128xbf16>,
    %37 = vector.extract_strided_slice %31 {offsets = [0, 128], sizes = [16, 128], strides = [1, 1]} : vector<16x384xf32> to vector<16x128xf32>
    %38 = arith.truncf %37 : vector<16x128xf32> to vector<16x128xbf16>
    %c1 = arith.constant 1 : index
    %c0_18 = arith.constant 0 : index
    %c0_19 = arith.constant 0 : index
    %39 = vector.load %arg17[%c1, %c0_18, %c0_19] : memref<3x16x128xbf16, #tpu.memory_space<vmem>>, vector<1x16x128xbf16>
    %40 = vector.shape_cast %39 : vector<1x16x128xbf16> to vector<16x128xbf16>
    %41 = vector.shape_cast %38 : vector<16x128xbf16> to vector<1x16x128xbf16>
    tpu.vector_store %arg17[%c1, %c0_18, %c0_19], %41 {strides = array<i32>} : memref<3x16x128xbf16, #tpu.memory_space<vmem>>, vector<1x16x128xbf16>,
    %42 = vector.extract_strided_slice %31 {offsets = [0, 256], sizes = [16, 128], strides = [1, 1]} : vector<16x384xf32> to vector<16x128xf32>
    %43 = arith.truncf %42 : vector<16x128xf32> to vector<16x128xbf16>
    %c2 = arith.constant 2 : index
    %c0_20 = arith.constant 0 : index
    %c0_21 = arith.constant 0 : index
    %44 = vector.load %arg17[%c2, %c0_20, %c0_21] : memref<3x16x128xbf16, #tpu.memory_space<vmem>>, vector<1x16x128xbf16>
    %45 = vector.shape_cast %44 : vector<1x16x128xbf16> to vector<16x128xbf16>
    %46 = vector.shape_cast %43 : vector<16x128xbf16> to vector<1x16x128xbf16>
    tpu.vector_store %arg17[%c2, %c0_20, %c0_21], %46 {strides = array<i32>} : memref<3x16x128xbf16, #tpu.memory_space<vmem>>, vector<1x16x128xbf16>,
    %c0_i32 = arith.constant 0 : i32
    %c3_i32 = arith.constant 3 : i32
    %47 = arith.muli %c3_i32, %c0_i32 : i32
    %c0_i32_22 = arith.constant 0 : i32
    %48 = arith.addi %47, %c0_i32_22 : i32
    %49 = arith.index_cast %48 : i32 to index
    %c0_23 = arith.constant 0 : index
    %c0_24 = arith.constant 0 : index
    %50 = vector.load %arg17[%49, %c0_23, %c0_24] : memref<3x16x128xbf16, #tpu.memory_space<vmem>>, vector<1x16x128xbf16>
    %51 = vector.shape_cast %50 : vector<1x16x128xbf16> to vector<16x128xbf16>
    %c3_i32_25 = arith.constant 3 : i32
    %52 = arith.muli %c3_i32_25, %c0_i32 : i32
    %c1_i32 = arith.constant 1 : i32
    %53 = arith.addi %52, %c1_i32 : i32
    %54 = arith.index_cast %53 : i32 to index
    %c0_26 = arith.constant 0 : index
    %c0_27 = arith.constant 0 : index
    %55 = vector.load %arg17[%54, %c0_26, %c0_27] : memref<3x16x128xbf16, #tpu.memory_space<vmem>>, vector<1x16x128xbf16>
    %56 = vector.shape_cast %55 : vector<1x16x128xbf16> to vector<16x128xbf16>
    %c3_i32_28 = arith.constant 3 : i32
    %57 = arith.muli %c3_i32_28, %c0_i32 : i32
    %c2_i32 = arith.constant 2 : i32
    %58 = arith.addi %57, %c2_i32 : i32
    %59 = arith.index_cast %58 : i32 to index
    %c0_29 = arith.constant 0 : index
    %c0_30 = arith.constant 0 : index
    %60 = vector.load %arg17[%59, %c0_29, %c0_30] : memref<3x16x128xbf16, #tpu.memory_space<vmem>>, vector<1x16x128xbf16>
    %61 = vector.shape_cast %60 : vector<1x16x128xbf16> to vector<16x128xbf16>
    %62 = vector.extract_strided_slice %51 {offsets = [0, 0], sizes = [16, 32], strides = [1, 1]} : vector<16x128xbf16> to vector<16x32xbf16>
    %63 = vector.extract_strided_slice %56 {offsets = [0, 0], sizes = [16, 32], strides = [1, 1]} : vector<16x128xbf16> to vector<16x32xbf16>
    %64 = vector.extract_strided_slice %61 {offsets = [0, 0], sizes = [16, 32], strides = [1, 1]} : vector<16x128xbf16> to vector<16x32xbf16>
    %cst_31 = arith.constant dense<0.000000e+00> : vector<16x16xf32>
    %65 = tpu.matmul %62, %63, %cst_31 {dimension_numbers = #tpu.dot_dimension_numbers<[1], [1], [0], [0], [0, 0, 1, 0], [], []>} : vector<16x32xbf16>, vector<16x32xbf16>, vector<16x16xf32> -> vector<16x16xf32>
    %cst_32 = arith.constant dense<0xFF800000> : vector<16xf32>
    %66 = vector.multi_reduction <maximumf>, %65, %cst_32 [1] : vector<16x16xf32> to vector<16xf32>
    %67 = vector.shape_cast %66 : vector<16xf32> to vector<16x1xf32>
    %68 = vector.broadcast %67 : vector<16x1xf32> to vector<16x16xf32>
    %69 = arith.subf %65, %68 : vector<16x16xf32>
    %70 = math.exp %69 : vector<16x16xf32>
    %cst_33 = arith.constant dense<0.000000e+00> : vector<16xf32>
    %71 = vector.multi_reduction <add>, %70, %cst_33 [1] : vector<16x16xf32> to vector<16xf32>
    %72 = vector.shape_cast %71 : vector<16xf32> to vector<16x1xf32>
    %73 = tpu.reciprocal %72 {approx = true} : vector<16x1xf32> -> vector<16x1xf32>
    %74 = vector.broadcast %73 : vector<16x1xf32> to vector<16x16xf32>
    %75 = arith.mulf %70, %74 : vector<16x16xf32>
    %76 = arith.truncf %75 : vector<16x16xf32> to vector<16x16xbf16>
    %cst_34 = arith.constant dense<0.000000e+00> : vector<16x32xf32>
    %77 = tpu.matmul %76, %64, %cst_34 {dimension_numbers = #tpu.dot_dimension_numbers<[1], [0], [0], [1], [0, 0, 1, 1], [], []>} : vector<16x16xbf16>, vector<16x32xbf16>, vector<16x32xf32> -> vector<16x32xf32>
    %78 = arith.truncf %77 : vector<16x32xf32> to vector<16x32xbf16>
    %79 = vector.extract_strided_slice %51 {offsets = [0, 32], sizes = [16, 32], strides = [1, 1]} : vector<16x128xbf16> to vector<16x32xbf16>
    %80 = vector.extract_strided_slice %56 {offsets = [0, 32], sizes = [16, 32], strides = [1, 1]} : vector<16x128xbf16> to vector<16x32xbf16>
    %81 = vector.extract_strided_slice %61 {offsets = [0, 32], sizes = [16, 32], strides = [1, 1]} : vector<16x128xbf16> to vector<16x32xbf16>
    %cst_35 = arith.constant dense<0.000000e+00> : vector<16x16xf32>
    %82 = tpu.matmul %79, %80, %cst_35 {dimension_numbers = #tpu.dot_dimension_numbers<[1], [1], [0], [0], [0, 0, 1, 0], [], []>} : vector<16x32xbf16>, vector<16x32xbf16>, vector<16x16xf32> -> vector<16x16xf32>
    %cst_36 = arith.constant dense<0xFF800000> : vector<16xf32>
    %83 = vector.multi_reduction <maximumf>, %82, %cst_36 [1] : vector<16x16xf32> to vector<16xf32>
    %84 = vector.shape_cast %83 : vector<16xf32> to vector<16x1xf32>
    %85 = vector.broadcast %84 : vector<16x1xf32> to vector<16x16xf32>
    %86 = arith.subf %82, %85 : vector<16x16xf32>
    %87 = math.exp %86 : vector<16x16xf32>
    %cst_37 = arith.constant dense<0.000000e+00> : vector<16xf32>
    %88 = vector.multi_reduction <add>, %87, %cst_37 [1] : vector<16x16xf32> to vector<16xf32>
    %89 = vector.shape_cast %88 : vector<16xf32> to vector<16x1xf32>
    %90 = tpu.reciprocal %89 {approx = true} : vector<16x1xf32> -> vector<16x1xf32>
    %91 = vector.broadcast %90 : vector<16x1xf32> to vector<16x16xf32>
    %92 = arith.mulf %87, %91 : vector<16x16xf32>
    %93 = arith.truncf %92 : vector<16x16xf32> to vector<16x16xbf16>
    %cst_38 = arith.constant dense<0.000000e+00> : vector<16x32xf32>
    %94 = tpu.matmul %93, %81, %cst_38 {dimension_numbers = #tpu.dot_dimension_numbers<[1], [0], [0], [1], [0, 0, 1, 1], [], []>} : vector<16x16xbf16>, vector<16x32xbf16>, vector<16x32xf32> -> vector<16x32xf32>
    %95 = arith.truncf %94 : vector<16x32xf32> to vector<16x32xbf16>
    %96 = vector.extract_strided_slice %51 {offsets = [0, 64], sizes = [16, 32], strides = [1, 1]} : vector<16x128xbf16> to vector<16x32xbf16>
    %97 = vector.extract_strided_slice %56 {offsets = [0, 64], sizes = [16, 32], strides = [1, 1]} : vector<16x128xbf16> to vector<16x32xbf16>
    %98 = vector.extract_strided_slice %61 {offsets = [0, 64], sizes = [16, 32], strides = [1, 1]} : vector<16x128xbf16> to vector<16x32xbf16>
    %cst_39 = arith.constant dense<0.000000e+00> : vector<16x16xf32>
    %99 = tpu.matmul %96, %97, %cst_39 {dimension_numbers = #tpu.dot_dimension_numbers<[1], [1], [0], [0], [0, 0, 1, 0], [], []>} : vector<16x32xbf16>, vector<16x32xbf16>, vector<16x16xf32> -> vector<16x16xf32>
    %cst_40 = arith.constant dense<0xFF800000> : vector<16xf32>
    %100 = vector.multi_reduction <maximumf>, %99, %cst_40 [1] : vector<16x16xf32> to vector<16xf32>
    %101 = vector.shape_cast %100 : vector<16xf32> to vector<16x1xf32>
    %102 = vector.broadcast %101 : vector<16x1xf32> to vector<16x16xf32>
    %103 = arith.subf %99, %102 : vector<16x16xf32>
    %104 = math.exp %103 : vector<16x16xf32>
    %cst_41 = arith.constant dense<0.000000e+00> : vector<16xf32>
    %105 = vector.multi_reduction <add>, %104, %cst_41 [1] : vector<16x16xf32> to vector<16xf32>
    %106 = vector.shape_cast %105 : vector<16xf32> to vector<16x1xf32>
    %107 = tpu.reciprocal %106 {approx = true} : vector<16x1xf32> -> vector<16x1xf32>
    %108 = vector.broadcast %107 : vector<16x1xf32> to vector<16x16xf32>
    %109 = arith.mulf %104, %108 : vector<16x16xf32>
    %110 = arith.truncf %109 : vector<16x16xf32> to vector<16x16xbf16>
    %cst_42 = arith.constant dense<0.000000e+00> : vector<16x32xf32>
    %111 = tpu.matmul %110, %98, %cst_42 {dimension_numbers = #tpu.dot_dimension_numbers<[1], [0], [0], [1], [0, 0, 1, 1], [], []>} : vector<16x16xbf16>, vector<16x32xbf16>, vector<16x32xf32> -> vector<16x32xf32>
    %112 = arith.truncf %111 : vector<16x32xf32> to vector<16x32xbf16>
    %113 = vector.extract_strided_slice %51 {offsets = [0, 96], sizes = [16, 32], strides = [1, 1]} : vector<16x128xbf16> to vector<16x32xbf16>
    %114 = vector.extract_strided_slice %56 {offsets = [0, 96], sizes = [16, 32], strides = [1, 1]} : vector<16x128xbf16> to vector<16x32xbf16>
    %115 = vector.extract_strided_slice %61 {offsets = [0, 96], sizes = [16, 32], strides = [1, 1]} : vector<16x128xbf16> to vector<16x32xbf16>
    %cst_43 = arith.constant dense<0.000000e+00> : vector<16x16xf32>
    %116 = tpu.matmul %113, %114, %cst_43 {dimension_numbers = #tpu.dot_dimension_numbers<[1], [1], [0], [0], [0, 0, 1, 0], [], []>} : vector<16x32xbf16>, vector<16x32xbf16>, vector<16x16xf32> -> vector<16x16xf32>
    %cst_44 = arith.constant dense<0xFF800000> : vector<16xf32>
    %117 = vector.multi_reduction <maximumf>, %116, %cst_44 [1] : vector<16x16xf32> to vector<16xf32>
    %118 = vector.shape_cast %117 : vector<16xf32> to vector<16x1xf32>
    %119 = vector.broadcast %118 : vector<16x1xf32> to vector<16x16xf32>
    %120 = arith.subf %116, %119 : vector<16x16xf32>
    %121 = math.exp %120 : vector<16x16xf32>
    %cst_45 = arith.constant dense<0.000000e+00> : vector<16xf32>
    %122 = vector.multi_reduction <add>, %121, %cst_45 [1] : vector<16x16xf32> to vector<16xf32>
    %123 = vector.shape_cast %122 : vector<16xf32> to vector<16x1xf32>
    %124 = tpu.reciprocal %123 {approx = true} : vector<16x1xf32> -> vector<16x1xf32>
    %125 = vector.broadcast %124 : vector<16x1xf32> to vector<16x16xf32>
    %126 = arith.mulf %121, %125 : vector<16x16xf32>
    %127 = arith.truncf %126 : vector<16x16xf32> to vector<16x16xbf16>
    %cst_46 = arith.constant dense<0.000000e+00> : vector<16x32xf32>
    %128 = tpu.matmul %127, %115, %cst_46 {dimension_numbers = #tpu.dot_dimension_numbers<[1], [0], [0], [1], [0, 0, 1, 1], [], []>} : vector<16x16xbf16>, vector<16x32xbf16>, vector<16x32xf32> -> vector<16x32xf32>
    %129 = arith.truncf %128 : vector<16x32xf32> to vector<16x32xbf16>
    %130 = tpu.concatenate %78, %95, %112, %129 in 1 : vector<16x32xbf16>, vector<16x32xbf16>, vector<16x32xbf16>, vector<16x32xbf16> -> vector<16x128xbf16>
    %131 = arith.index_cast %c0_i32 : i32 to index
    %c0_47 = arith.constant 0 : index
    %c0_48 = arith.constant 0 : index
    %132 = vector.load %arg18[%131, %c0_47, %c0_48] : memref<1x16x128xbf16, #tpu.memory_space<vmem>>, vector<1x16x128xbf16>
    %133 = vector.shape_cast %132 : vector<1x16x128xbf16> to vector<16x128xbf16>
    %134 = vector.shape_cast %130 : vector<16x128xbf16> to vector<1x16x128xbf16>
    tpu.vector_store %arg18[%131, %c0_47, %c0_48], %134 {strides = array<i32>} : memref<1x16x128xbf16, #tpu.memory_space<vmem>>, vector<1x16x128xbf16>,
    %c1_i32_49 = arith.constant 1 : i32
    %c0_50 = arith.constant 0 : index
    %c0_51 = arith.constant 0 : index
    %c0_52 = arith.constant 0 : index
    %135 = vector.load %arg18[%c0_50, %c0_51, %c0_52] : memref<1x16x128xbf16, #tpu.memory_space<vmem>>, vector<1x16x128xbf16>
    %136 = vector.shape_cast %135 : vector<1x16x128xbf16> to vector<16x128xbf16>
    %c0_53 = arith.constant 0 : index
    %c0_54 = arith.constant 0 : index
    %137 = vector.load %arg6[%c0_53, %c0_54] : memref<128x128xbf16, #tpu.memory_space<vmem>>, vector<128x128xbf16>
    %cst_55 = arith.constant dense<0.000000e+00> : vector<16x128xf32>
    %138 = tpu.matmul %136, %137, %cst_55 {dimension_numbers = #tpu.dot_dimension_numbers<[1], [0], [0], [1], [0, 0, 1, 1], [], []>} : vector<16x128xbf16>, vector<128x128xbf16>, vector<16x128xf32> -> vector<16x128xf32>
    %c0_56 = arith.constant 0 : index
    %c0_57 = arith.constant 0 : index
    %139 = vector.load %arg7[%c0_56, %c0_57] : memref<1x128xf32, #tpu.memory_space<vmem>>, vector<1x128xf32>
    %140 = vector.broadcast %139 : vector<1x128xf32> to vector<16x128xf32>
    %141 = arith.addf %138, %140 : vector<16x128xf32>
    %c0_58 = arith.constant 0 : index
    %c0_59 = arith.constant 0 : index
    %142 = vector.load %arg8[%c0_58, %c0_59] : memref<1x128xf32, #tpu.memory_space<vmem>>, vector<1x128xf32>
    %143 = vector.broadcast %142 : vector<1x128xf32> to vector<16x128xf32>
    %144 = arith.mulf %141, %143 : vector<16x128xf32>
    %145 = arith.addf %144, %1 : vector<16x128xf32>
    %c0_60 = arith.constant 0 : index
    %c0_61 = arith.constant 0 : index
    %146 = vector.load %arg9[%c0_60, %c0_61] : memref<1x128xf32, #tpu.memory_space<vmem>>, vector<1x128xf32>
    %c0_62 = arith.constant 0 : index
    %c0_63 = arith.constant 0 : index
    %147 = vector.load %arg10[%c0_62, %c0_63] : memref<1x128xf32, #tpu.memory_space<vmem>>, vector<1x128xf32>
    %cst_64 = arith.constant dense<0.000000e+00> : vector<16xf32>
    %148 = vector.multi_reduction <add>, %145, %cst_64 [1] : vector<16x128xf32> to vector<16xf32>
    %149 = vector.shape_cast %148 : vector<16xf32> to vector<16x1xf32>
    %cst_65 = arith.constant 1.280000e+02 : f32
    %150 = vector.broadcast %cst_65 : f32 to vector<16x1xf32>
    %151 = arith.divf %149, %150 : vector<16x1xf32>
    %152 = vector.broadcast %151 : vector<16x1xf32> to vector<16x128xf32>
    %153 = arith.subf %145, %152 : vector<16x128xf32>
    %154 = arith.mulf %153, %153 : vector<16x128xf32>
    %cst_66 = arith.constant dense<0.000000e+00> : vector<16xf32>
    %155 = vector.multi_reduction <add>, %154, %cst_66 [1] : vector<16x128xf32> to vector<16xf32>
    %156 = vector.shape_cast %155 : vector<16xf32> to vector<16x1xf32>
    %cst_67 = arith.constant 1.280000e+02 : f32
    %157 = vector.broadcast %cst_67 : f32 to vector<16x1xf32>
    %158 = arith.divf %156, %157 : vector<16x1xf32>
    %159 = vector.broadcast %151 : vector<16x1xf32> to vector<16x128xf32>
    %160 = arith.subf %145, %159 : vector<16x128xf32>
    %cst_68 = arith.constant 9.99999997E-7 : f32
    %161 = vector.broadcast %cst_68 : f32 to vector<16x1xf32>
    %162 = arith.addf %158, %161 : vector<16x1xf32>
    %163 = math.rsqrt %162 : vector<16x1xf32>
    %164 = vector.broadcast %163 : vector<16x1xf32> to vector<16x128xf32>
    %165 = arith.mulf %160, %164 : vector<16x128xf32>
    %166 = vector.broadcast %146 : vector<1x128xf32> to vector<16x128xf32>
    %167 = arith.mulf %165, %166 : vector<16x128xf32>
    %168 = vector.broadcast %147 : vector<1x128xf32> to vector<16x128xf32>
    %169 = arith.addf %167, %168 : vector<16x128xf32>
    %170 = arith.truncf %169 : vector<16x128xf32> to vector<16x128xbf16>
    %c0_69 = arith.constant 0 : index
    %c0_70 = arith.constant 0 : index
    %171 = vector.load %arg11[%c0_69, %c0_70] : memref<128x512xbf16, #tpu.memory_space<vmem>>, vector<128x512xbf16>
    %cst_71 = arith.constant dense<0.000000e+00> : vector<16x512xf32>
    %172 = tpu.matmul %170, %171, %cst_71 {dimension_numbers = #tpu.dot_dimension_numbers<[1], [0], [0], [1], [0, 0, 1, 1], [], []>} : vector<16x128xbf16>, vector<128x512xbf16>, vector<16x512xf32> -> vector<16x512xf32>
    %c0_72 = arith.constant 0 : index
    %c0_73 = arith.constant 0 : index
    %173 = vector.load %arg12[%c0_72, %c0_73] : memref<1x512xf32, #tpu.memory_space<vmem>>, vector<1x512xf32>
    %174 = vector.broadcast %173 : vector<1x512xf32> to vector<16x512xf32>
    %175 = arith.addf %172, %174 : vector<16x512xf32>
    %cst_74 = arith.constant 0.636619746 : f32
    %176 = math.sqrt %cst_74 : f32
    %cst_75 = arith.constant 5.000000e-01 : f32
    %177 = vector.broadcast %cst_75 : f32 to vector<16x512xf32>
    %178 = arith.mulf %177, %175 : vector<16x512xf32>
    %cst_76 = arith.constant 4.471500e-02 : f32
    %179 = vector.broadcast %cst_76 : f32 to vector<16x512xf32>
    %180 = arith.mulf %179, %175 : vector<16x512xf32>
    %181 = arith.mulf %180, %175 : vector<16x512xf32>
    %182 = arith.mulf %181, %175 : vector<16x512xf32>
    %183 = arith.addf %175, %182 : vector<16x512xf32>
    %184 = vector.broadcast %176 : f32 to vector<16x512xf32>
    %185 = arith.mulf %184, %183 : vector<16x512xf32>
    %186 = math.tanh %185 : vector<16x512xf32>
    %cst_77 = arith.constant 1.000000e+00 : f32
    %187 = vector.broadcast %cst_77 : f32 to vector<16x512xf32>
    %188 = arith.addf %187, %186 : vector<16x512xf32>
    %189 = arith.mulf %178, %188 : vector<16x512xf32>
    %190 = arith.truncf %189 : vector<16x512xf32> to vector<16x512xbf16>
    %c0_78 = arith.constant 0 : index
    %c0_79 = arith.constant 0 : index
    %191 = vector.load %arg13[%c0_78, %c0_79] : memref<512x128xbf16, #tpu.memory_space<vmem>>, vector<512x128xbf16>
    %cst_80 = arith.constant dense<0.000000e+00> : vector<16x128xf32>
    %192 = tpu.matmul %190, %191, %cst_80 {dimension_numbers = #tpu.dot_dimension_numbers<[1], [0], [0], [1], [0, 0, 1, 1], [], []>} : vector<16x512xbf16>, vector<512x128xbf16>, vector<16x128xf32> -> vector<16x128xf32>
    %c0_81 = arith.constant 0 : index
    %c0_82 = arith.constant 0 : index
    %193 = vector.load %arg14[%c0_81, %c0_82] : memref<1x128xf32, #tpu.memory_space<vmem>>, vector<1x128xf32>
    %194 = vector.broadcast %193 : vector<1x128xf32> to vector<16x128xf32>
    %195 = arith.addf %192, %194 : vector<16x128xf32>
    %c0_83 = arith.constant 0 : index
    %c0_84 = arith.constant 0 : index
    %196 = vector.load %arg15[%c0_83, %c0_84] : memref<1x128xf32, #tpu.memory_space<vmem>>, vector<1x128xf32>
    %197 = vector.broadcast %196 : vector<1x128xf32> to vector<16x128xf32>
    %198 = arith.mulf %195, %197 : vector<16x128xf32>
    %199 = arith.addf %198, %145 : vector<16x128xf32>
    %c0_85 = arith.constant 0 : index
    %c0_86 = arith.constant 0 : index
    %c0_87 = arith.constant 0 : index
    %200 = vector.load %arg16[%c0_85, %c0_86, %c0_87] : memref<1x16x128xf32, #tpu.memory_space<vmem>>, vector<1x16x128xf32>
    %201 = vector.shape_cast %200 : vector<1x16x128xf32> to vector<16x128xf32>
    %202 = vector.shape_cast %199 : vector<16x128xf32> to vector<1x16x128xf32>
    tpu.vector_store %arg16[%c0_85, %c0_86, %c0_87], %202 {strides = array<i32>} : memref<1x16x128xf32, #tpu.memory_space<vmem>>, vector<1x16x128xf32>,
    return
  }
  func.func @transform_0(%arg0: i32) -> (i32, i32, i32) {
    %c0_i32 = arith.constant 0 : i32
    %c0_i32_0 = arith.constant 0 : i32
    %c0_i32_1 = arith.constant 0 : i32
    return %arg0, %c0_i32, %c0_i32_0 : i32, i32, i32
  }
  func.func @transform_1(%arg0: i32) -> (i32, i32) {
    %c0_i32 = arith.constant 0 : i32
    %c0_i32_0 = arith.constant 0 : i32
    %c0_i32_1 = arith.constant 0 : i32
    return %c0_i32, %c0_i32_0 : i32, i32
  }
  func.func @transform_2(%arg0: i32) -> (i32, i32) {
    %c0_i32 = arith.constant 0 : i32
    %c0_i32_0 = arith.constant 0 : i32
    %c0_i32_1 = arith.constant 0 : i32
    return %c0_i32, %c0_i32_0 : i32, i32
  }
  func.func @transform_3(%arg0: i32) -> (i32, i32) {
    %c0_i32 = arith.constant 0 : i32
    %c0_i32_0 = arith.constant 0 : i32
    %c0_i32_1 = arith.constant 0 : i32
    return %c0_i32, %c0_i32_0 : i32, i32
  }
  func.func @transform_4(%arg0: i32) -> (i32, i32) {
    %c0_i32 = arith.constant 0 : i32
    %c0_i32_0 = arith.constant 0 : i32
    %c0_i32_1 = arith.constant 0 : i32
    return %c0_i32, %c0_i32_0 : i32, i32
  }
  func.func @transform_5(%arg0: i32) -> (i32, i32) {
    %c0_i32 = arith.constant 0 : i32
    %c0_i32_0 = arith.constant 0 : i32
    %c0_i32_1 = arith.constant 0 : i32
    return %c0_i32, %c0_i32_0 : i32, i32
  }
  func.func @transform_6(%arg0: i32) -> (i32, i32) {
    %c0_i32 = arith.constant 0 : i32
    %c0_i32_0 = arith.constant 0 : i32
    %c0_i32_1 = arith.constant 0 : i32
    return %c0_i32, %c0_i32_0 : i32, i32
  }
  func.func @transform_7(%arg0: i32) -> (i32, i32) {
    %c0_i32 = arith.constant 0 : i32
    %c0_i32_0 = arith.constant 0 : i32
    %c0_i32_1 = arith.constant 0 : i32
    return %c0_i32, %c0_i32_0 : i32, i32
  }
  func.func @transform_8(%arg0: i32) -> (i32, i32) {
    %c0_i32 = arith.constant 0 : i32
    %c0_i32_0 = arith.constant 0 : i32
    %c0_i32_1 = arith.constant 0 : i32
    return %c0_i32, %c0_i32_0 : i32, i32
  }
  func.func @transform_9(%arg0: i32) -> (i32, i32) {
    %c0_i32 = arith.constant 0 : i32
    %c0_i32_0 = arith.constant 0 : i32
    %c0_i32_1 = arith.constant 0 : i32
    return %c0_i32, %c0_i32_0 : i32, i32
  }
  func.func @transform_10(%arg0: i32) -> (i32, i32) {
    %c0_i32 = arith.constant 0 : i32
    %c0_i32_0 = arith.constant 0 : i32
    %c0_i32_1 = arith.constant 0 : i32
    return %c0_i32, %c0_i32_0 : i32, i32
  }
  func.func @transform_11(%arg0: i32) -> (i32, i32) {
    %c0_i32 = arith.constant 0 : i32
    %c0_i32_0 = arith.constant 0 : i32
    %c0_i32_1 = arith.constant 0 : i32
    return %c0_i32, %c0_i32_0 : i32, i32
  }
  func.func @transform_12(%arg0: i32) -> (i32, i32) {
    %c0_i32 = arith.constant 0 : i32
    %c0_i32_0 = arith.constant 0 : i32
    %c0_i32_1 = arith.constant 0 : i32
    return %c0_i32, %c0_i32_0 : i32, i32
  }
  func.func @transform_13(%arg0: i32) -> (i32, i32) {
    %c0_i32 = arith.constant 0 : i32
    %c0_i32_0 = arith.constant 0 : i32
    %c0_i32_1 = arith.constant 0 : i32
    return %c0_i32, %c0_i32_0 : i32, i32
  }
  func.func @transform_14(%arg0: i32) -> (i32, i32) {
    %c0_i32 = arith.constant 0 : i32
    %c0_i32_0 = arith.constant 0 : i32
    %c0_i32_1 = arith.constant 0 : i32
    return %c0_i32, %c0_i32_0 : i32, i32
  }
  func.func @transform_15(%arg0: i32) -> (i32, i32, i32) {
    %c0_i32 = arith.constant 0 : i32
    %c0_i32_0 = arith.constant 0 : i32
    %c0_i32_1 = arith.constant 0 : i32
    return %arg0, %c0_i32, %c0_i32_0 : i32, i32, i32
  }
}

</mosaic_0001>

<bundles_post_ra>
// kernel: tpu_custom_call.1
= control target key start
LH: loop header
LB: loop body
LE: loop exit
PB: predicated region body
PF: predicated region fallthrough
CT: control target
= control target key end

     0   :  { %s3892_s0 = inlined_call_operand.hbm [shape: f32[2,16,128], index: 0, kind: input, shape index: {}]   ;;  %s3893_s1 = inlined_call_operand.hbm [shape: f32[1,128], index: 1, kind: input, shape index: {}]   ;;  %s3894_s2 = inlined_call_operand.hbm [shape: f32[1,128], index: 2, kind: input, shape index: {}]   ;;  %s3895_s3 = inlined_call_operand.hbm [shape: bf16[128,384], index: 3, kind: input, shape index: {}]   ;;  %s3896_s4 = inlined_call_operand.vmem [shape: f32[1,384], index: 4, kind: input, shape index: {}]   ;;  %s3897_s5 = inlined_call_operand.hbm [shape: bf16[128,128], index: 5, kind: input, shape index: {}]   ;;  %s3898_s6 = inlined_call_operand.hbm [shape: f32[1,128], index: 6, kind: input, shape index: {}]   ;;  %s3899_s7 = inlined_call_operand.hbm [shape: f32[1,128], index: 7, kind: input, shape index: {}]   ;;  %s3900_s8 = inlined_call_operand.hbm [shape: f32[1,128], index: 8, kind: input, shape index: {}]   ;;  %s3901_s9 = inlined_call_operand.vmem [shape: f32[1,128], index: 9, kind: input, shape index: {}]   ;;  %s3902_s10 = inlined_call_operand.hbm [shape: bf16[128,512], index: 10, kind: input, shape index: {}]   ;;  %s3903_s11 = inlined_call_operand.vmem [shape: f32[1,512], index: 11, kind: input, shape index: {}]   ;;  %s3904_s12 = inlined_call_operand.hbm [shape: bf16[512,128], index: 12, kind: input, shape index: {}]   ;;  %s3905_s13 = inlined_call_operand.vmem [shape: f32[1,128], index: 13, kind: input, shape index: {}]   ;;  %s3906_s14 = inlined_call_operand.vmem [shape: f32[1,128], index: 14, kind: input, shape index: {}]   ;;  %s3907_s15 = inlined_call_operand.hbm [shape: f32[2,16,128], index: 15, kind: output, shape index: {}]  }
   0x1   :  { %3909 = sst [smem:[#allocation29_spill]] %s3893_s1 }
   0x2   :  { %3910 = sst [smem:[#allocation30_spill]] %s3894_s2 }
   0x3   :  { %3911 = sst [smem:[#allocation31_spill]] %s3895_s3 }
   0x4   :  { %3912 = sst [smem:[#allocation32_spill]] %s3897_s5 }
   0x5   :  { %3913 = sst [smem:[#allocation33_spill]] %s3898_s6 }
   0x6   :  { %3914 = sst [smem:[#allocation34_spill]] %s3901_s9 }
   0x7   :  { %3915 = sst [smem:[#allocation35_spill]] %s3903_s11 }
   0x8   :  { %3916 = sst [smem:[#allocation36_spill]] %s3905_s13 }
   0x9   :  { %3917 = sst [smem:[#allocation37_spill]] %s3906_s14 }
   0xa   :  { %3918 = sst [smem:[#allocation38_spill]] %s3907_s15 }
   0xb   :  { %20 = vsyncpa [#allocation5], 0 }
   0xc   :  { %22 = vsyncpa [#allocation5 + $0x1], 0 }
   0xd   :  { %23 = vsyncpa [#allocation8], 0 }
   0xe   :  { %24 = vsyncpa [#allocation11], 0 }
   0xf   :  { %25 = vsyncpa [#allocation14], 0 }
  0x10   :  { %26 = vsyncpa [#allocation17], 0 }
  0x11   :  { %27 = vsyncpa [#allocation20], 0 }
  0x12   :  { %28 = vsyncpa [#allocation6], 0 }
  0x13   :  { %30 = vsyncpa [#allocation6 + $0x1], 0  ;;  %s3529_s18 = smov 0   ;;  %s3531_s19 = smov 0  }
  0x14   :  { %s3533_s20 = smov 0   ;;  %s3535_s21 = smov 0  }
  0x15 LB: > { %s3919_s1 = sld [smem:[#allocation29_spill]]  ;;  %s3553_s25 = sadd.s32 4294967295, %s3424_s21   ;;  %s3424_s21 = sphi %s3535_s21, %s3940_s21   ;;  %s3420_s20 = sphi %s3533_s20, %s3939_s20   ;;  %s3416_s19 = sphi %s3531_s19, %s3938_s19   ;;  %s3412_s18 = sphi %s3529_s18, %s3937_s18  }
  0x16   : > { %p2265_p0 = scmp.ge.s32.totalorder %s3424_s21, 1  ;;  %p57_p1 = scmp.eq.s32.totalorder %s3553_s25, 0 }
  0x17   : > { %p387_p2 = scmp.lt.s32.totalorder %s3424_s21, 3  ;;  %s3426_s27 = smov [#allocation7]  }
  0x18   : > { %s401_s28 = sshll.u32 %s3426_s27, 4  ;;  %s3921_s3 = sld [smem:[#allocation31_spill]]  ;;  %s402_s28 = int_to_ptr.vmem [resolvable:$true] %s401_s28 }
  0x19   : > { %p3558_p3 = pnand %p2265_p0, %p387_p2  ;;  %s3427_s22 = smov [#allocation10]  }
  0x1a   : > { %s424_s23 = sshll.u32 %s3427_s22, 4  ;;  %s3428_s27 = smov 192   ;;  %s425_s23 = int_to_ptr.vmem [resolvable:$true] %s424_s23 }
  0x1b   : > { %s399_s24 = sshll.u32 %s3919_s1, 4  ;;  %p2861_p5 = pneg %p3558_p3  ;;  %s400_s24 = int_to_ptr.hbm [resolvable:$true] %s399_s24 }
  0x1c   : > { %s3429_s1 = smov 12   ;;  %s3923_s6 = sld [smem:[#allocation33_spill]] }
  0x1d   : > { %p3570_p6 = pnand %p2861_p5, %p57_p1  ;;  %s3430_s15 = smov [#allocation13]  }
  0x1e   : > { %s422_s16 = sshll.u32 %s3921_s3, 4  ;;  %s456_s14 = sshll.u32 %s3430_s15, 4  ;;  %s423_s16 = int_to_ptr.hbm [resolvable:$true] %s422_s16  ;;  %s457_s14 = int_to_ptr.vmem [resolvable:$true] %s456_s14 }
  0x1f   : > { %2864 = dma.hbm_to_vmem [thread:$0]  (!%p3570_p6), %s400_s24, 16, %s402_s28, [#allocation8]  }
  0x20   : > { %2870 = dma.hbm_to_vmem [thread:$0]  (!%p3570_p6), %s423_s16, 3072, %s425_s23, [#allocation11], %s3428_s27, %s3428_s27, %s3429_s1  }
  0x21   : > { %s478_s22 = sshll.u32 %s3900_s8, 4  ;;  %s3431_s24 = smov [#allocation16]   ;;  %s479_s22 = int_to_ptr.hbm [resolvable:$true] %s478_s22 }
  0x22   : > { %s454_s3 = sshll.u32 %s3923_s6, 4  ;;  %s480_s28 = sshll.u32 %s3431_s24, 4  ;;  %s455_s3 = int_to_ptr.hbm [resolvable:$true] %s454_s3  ;;  %s481_s28 = int_to_ptr.vmem [resolvable:$true] %s480_s28 }
  0x23   : > { %2876 = dma.hbm_to_vmem [thread:$0]  (!%p3570_p6), %s455_s3, 16, %s457_s14, [#allocation14]  }
  0x24   : > { %s3924_s2 = sld [smem:[#allocation30_spill]]  ;;  %s3432_s11 = smov [#allocation9]  }
  0x25   : > { %2882 = dma.hbm_to_vmem [thread:$0]  (!%p3570_p6), %s479_s22, 16, %s481_s28, [#allocation17]  }
  0x26   : > { %s3925_s5 = sld [smem:[#allocation32_spill]]  ;;  %s413_s13 = sshll.u32 %s3432_s11, 4  ;;  %s414_s13 = int_to_ptr.vmem [resolvable:$true] %s413_s13 }
  0x27   : > { %s3433_s3 = smov [#allocation12]   ;;  %s3434_s9 = smov 64  }
  0x28   : > { %s441_s14 = sshll.u32 %s3433_s3, 4  ;;  %s3435_s29 = smov 4   ;;  %s442_s14 = int_to_ptr.vmem [resolvable:$true] %s441_s14 }
  0x29   : > { %s466_s24 = sshll.u32 %s3899_s7, 4  ;;  %s3436_s28 = smov [#allocation15]   ;;  %s467_s24 = int_to_ptr.hbm [resolvable:$true] %s466_s24 }
  0x2a   : > { %s411_s16 = sshll.u32 %s3924_s2, 4  ;;  %s468_s1 = sshll.u32 %s3436_s28, 4  ;;  %s412_s16 = int_to_ptr.hbm [resolvable:$true] %s411_s16  ;;  %s469_s1 = int_to_ptr.vmem [resolvable:$true] %s468_s1 }
  0x2b   : > { %2867 = dma.hbm_to_vmem [thread:$0]  (!%p3570_p6), %s412_s16, 16, %s414_s13, [#allocation8]  }
  0x2c   : > { %s439_s27 = sshll.u32 %s3925_s5, 4  ;;  %s492_s16 = sshll.u32 %s3902_s10, 4  ;;  %s440_s27 = int_to_ptr.hbm [resolvable:$true] %s439_s27  ;;  %s493_s16 = int_to_ptr.hbm [resolvable:$true] %s492_s16 }
  0x2d   : > { %2873 = dma.hbm_to_vmem [thread:$0]  (!%p3570_p6), %s440_s27, 1024, %s442_s14, [#allocation11], %s3434_s9, %s3434_s9, %s3435_s29  }
  0x2e   : > { %2879 = dma.hbm_to_vmem [thread:$0]  (!%p3570_p6), %s467_s24, 16, %s469_s1, [#allocation14]  }
  0x2f   : > { %s3437_s27 = smov [#allocation18]   ;;  %s3438_s13 = smov 256  }
  0x30   : > { %s494_s11 = sshll.u32 %s3437_s27, 4  ;;  %s3439_s3 = smov 16   ;;  %s495_s11 = int_to_ptr.vmem [resolvable:$true] %s494_s11 }
  0x31   : > { %2885 = dma.hbm_to_vmem [thread:$0]  (!%p3570_p6), %s493_s16, 4096, %s495_s11, [#allocation17], %s3438_s13, %s3438_s13, %s3439_s3  }
  0x32   : > { %s509_s22 = sshll.u32 %s3904_s12, 4  ;;  %s3440_s24 = smov [#allocation19]   ;;  %s510_s22 = int_to_ptr.hbm [resolvable:$true] %s509_s22 }
  0x33   : > { %s511_s28 = sshll.u32 %s3440_s24, 4  ;;  %s2264_s1 = sadd.s32 4294967294, %s3424_s21   ;;  %s512_s28 = int_to_ptr.vmem [resolvable:$true] %s511_s28 }
  0x34   : > { %2888 = dma.hbm_to_vmem [thread:$0]  (!%p3570_p6), %s510_s22, 4096, %s512_s28, [#allocation20], %s3434_s9, %s3434_s9, %s3435_s29  }
  0x35   : > { %s3615_s15 = sadd.s32 1, %s3424_s21   ;;  %s43_s23 = sadd.s32 1, %s3420_s20 }
  0x36   : > { %s40_s16 = ssub.s32 %s3424_s21, %s3615_s15  ;;  %p50_p7 = scmp.ne.s32.totalorder %s3420_s20, %s3416_s19 }
  0x37   : > { %p41_p8 = scmp.eq.s32.totalorder %s40_s16, 0  ;;  %p51_p9 = scmp.eq.s32.totalorder %s3424_s21, 0 }
  0x38   : > { %p56_p10 = scmp.ne.s32.totalorder %s3416_s19, %s3412_s18  ;;  %p374_p11 = scmp.eq.s32.totalorder %s3553_s25, 1 }
  0x39   : > { %s3627_s27 = scalar_select %p41_p8, %s3420_s20, %s43_s23  }
  0x3a   : > { %p3629_p12 = por %p51_p9, %p50_p7  ;;  %p3635_p13 = por %p57_p1, %p56_p10 }
  0x3b   : > { %p3639_p0 = por %p374_p11, %p50_p7  ;;  %p380_p2 = scmp.eq.s32.totalorder %s2264_s1, 1 }
  0x3c   : > { %p2906_p5 = scmp.lt.s32.totalorder %s3424_s21, 2  ;;  %s531_s29 = sand.u32 1, %s3420_s20  }
  0x3d   : > { %p3645_p6 = por %p380_p2, %p56_p10  ;;  %s2276_s3 = sshll.u32 %s531_s29, 4 }
  0x3e   : > { %s2704_s14 = sshll.u32 %s3424_s21, 4  ;;  %s535_s23 = scalar_lea.vmem [#allocation4], %s2276_s3 }
  0x3f   : > { %s540_s24 = scalar_lea.hbm %s3892_s0, %s2704_s14  ;;  %s543_s16 = sshll.u32 %s535_s23, 4  ;;  %s544_s16 = int_to_ptr.vmem [resolvable:$true] %s543_s16 }
  0x40   : > { %s541_s28 = sshll.u32 %s540_s24, 4  ;;  %p3655_p7 = pnand %p2906_p5, %p3629_p12  ;;  %s542_s28 = int_to_ptr.hbm [resolvable:$true] %s541_s28 }
  0x41   : > { %s532_s2 = scalar_lea.sflag [#allocation5], %s531_s29  ;;  %s3308_s5 = sshra.s32 %s542_s28, 4  ;;  %s3309_s5 = int_to_ptr.hbm [resolvable:$true] %s3308_s5 }
  0x42   : > { %s3310_s6 = scalar_lea.hbm %s3309_s5, 16  ;;  %p3312_p9 = pneg %p3655_p7 }
  0x43   : > { %p3311_p8 = scmp.ne.s32.totalorder %s3309_s5, %s3310_s6  ;;  %s3315_s30 = scalar_lea.hbm %s3892_s0, 32 }
  0x44   : > { %p3316_p12 = scmp.lt.s32.totalorder %s3309_s5, %s3892_s0  ;;  %p3317_p2 = scmp.lt.s32.totalorder %s3315_s30, %s3310_s6 }
  0x45   : > { %p3313_p10 = pnand %p3312_p9, %p3311_p8 }
  0x46   : > { %p3318_p5 = por %p3317_p2, %p3316_p12 }
  0x47   : > { %p3314_p11 = pneg %p3313_p10 }
  0x49   : > { %p3319_p4 = pnand %p3318_p5, %p3314_p11 }
  0x4b   : > { %3322 = shalt.err (!%p3319_p4)
}
  0x4c   : > { %s3441_s29 = smov 128   ;;  %s3442_s24 = smov 8  }
  0x4d   : > { %2892 = dma.hbm_to_vmem [thread:$0]  (!%p3655_p7), %s542_s28, 256, %s544_s16, %s532_s2, %s3441_s29, %s3441_s29, %s3442_s24  }
  0x4e   : > { %555 = sbr.rel (%p3558_p3) target bundleno = 2359 (0x937), region = 80  ;;  %s3672_s23 = sand.u32 (!%p3558_p3), 1, %s3416_s19  }
  0x4f   : > { %s2280_s5 = sshll.u32 (!%p3558_p3), %s3672_s23, 4  ;;  %s558_s6 = scalar_lea.sflag (!%p3558_p3), [#allocation5], %s3672_s23 }
  0x50   : > { %s561_s14 = scalar_lea.vmem (!%p3558_p3), [#allocation4], %s2280_s5 }
  0x53   : > { %3383 = dma.done.wait (%p3635_p13), %s558_s6, 256  }
  0x54   : > { %3385 = vsyncadd (%p3635_p13), %s558_s6, 4294967040 }
  0x55   : > { %3387 = dma.done.wait (%p57_p1), [#allocation8], 32  }
  0x56   : > { %3389 = vsyncadd (%p57_p1), [#allocation8], 4294967264 }
  0x57   : > { %3391 = dma.done.wait (%p57_p1), [#allocation11], 4096  }
  0x58   : > { %3393 = vsyncadd (%p57_p1), [#allocation11], 4294963200 }
  0x59   : > { %3395 = dma.done.wait (%p57_p1), [#allocation14], 32  }
  0x5a   : > { %3397 = vsyncadd (%p57_p1), [#allocation14], 4294967264 }
  0x5b   : > { %3399 = dma.done.wait (%p57_p1), [#allocation17], 4112  }
  0x5c   : > { %3401 = vsyncadd (%p57_p1), [#allocation17], 4294963184 }
  0x5d   : > { %3403 = dma.done.wait (%p57_p1), [#allocation20], 4096  }
  0x5e   : > { %3405 = vsyncadd (%p57_p1), [#allocation20], 4294963200  ;;  %v3702_v0 = vld [vmem:[%s561_s14] sm:$0xff]  ;;  %v3705_v1 = vld [vmem:[%s561_s14 + $0x8] sm:$0xff]  ;;  %v3443_v2 = vmov 128.0   ;;  %vm957_vm7 = vcmask 261120  }
  0x5f   : > { %659 = vadd.xlane.f32.xlu0 %v3702_v0  ;;  %2980 = vrcp.f32 %v3443_v2  ;;  %v2377_v17 = vld [vmem:[#allocation10 + $0xa8] sm:$0xf]  ;;  %v2727_v18 = vld [vmem:[#allocation10 + $0xb0] sm:$0xf0]  ;;  %v2726_v19 = vld [vmem:[#allocation10 + $0xac] sm:$0xf] }
  0x60   : > { %v2378_v20 = vor.u32 %v2727_v18, %v2377_v17  ;;  %v2379_v21 = vld [vmem:[#allocation10 + $0xb4] sm:$0xf0]  ;;  %v2385_v22 = vld [vmem:[#allocation10 + $0xb0] sm:$0xf]  ;;  %v2728_v23 = vld [vmem:[#allocation10 + $0xb8] sm:$0xf0] }
  0x61   : > { %v2382_v24 = vor.u32 %v2726_v19, %v2379_v21  ;;  %v2386_v25 = vor.u32 %v2728_v23, %v2385_v22  ;;  %v2365_v26 = vld [vmem:[#allocation10 + $0x90] sm:$0xf]  ;;  %v2724_v27 = vld [vmem:[#allocation10 + $0x98] sm:$0xf0]  ;;  %v2723_v28 = vld [vmem:[#allocation10 + $0x94] sm:$0xf] }
  0x62   : > { %885 = vmatpush.bf16.msra.mxu0 %v2378_v20  ;;  %v2366_v29 = vor.u32 %v2724_v27, %v2365_v26  ;;  %v2367_v30 = vld [vmem:[#allocation10 + $0x9c] sm:$0xf0]  ;;  %v2373_v31 = vld [vmem:[#allocation10 + $0x98] sm:$0xf]  ;;  %v2725_v32 = vld [vmem:[#allocation10 + $0xa0] sm:$0xf0] }
  0x63   : > { %899 = vmatpush.bf16.msra.mxu1 %v2382_v24  ;;  %913 = vmatpush.bf16.msra.mxu2 %v2386_v25  ;;  %v2370_v33 = vor.u32 %v2723_v28, %v2367_v30  ;;  %v2374_v34 = vor.u32 %v2725_v32, %v2373_v31  ;;  %v2353_v35 = vld [vmem:[#allocation10 + $0x78] sm:$0xf]  ;;  %v2721_v36 = vld [vmem:[#allocation10 + $0x80] sm:$0xf0]  ;;  %v2720_v37 = vld [vmem:[#allocation10 + $0x7c] sm:$0xf] }
  0x64   : > { %v2354_v38 = vor.u32 %v2721_v36, %v2353_v35  ;;  %v2355_v39 = vld [vmem:[#allocation10 + $0x84] sm:$0xf0]  ;;  %v2361_v40 = vld [vmem:[#allocation10 + $0x80] sm:$0xf]  ;;  %v2722_v41 = vld [vmem:[#allocation10 + $0x88] sm:$0xf0] }
  0x65   : > { %v2981_v3 = vpop.eup %2980  ;;  %v2358_v42 = vor.u32 %v2720_v37, %v2355_v39  ;;  %v2362_v43 = vor.u32 %v2722_v41, %v2361_v40  ;;  %v2341_v44 = vld [vmem:[#allocation10 + $0x60] sm:$0xf]  ;;  %v2718_v45 = vld [vmem:[#allocation10 + $0x68] sm:$0xf0]  ;;  %v2717_v46 = vld [vmem:[#allocation10 + $0x64] sm:$0xf] }
  0x66   : > { %v664_v4 = vmul.f32 128.0, %v2981_v3  ;;  %vm668_vm0 = vweird.f32 %v2981_v3  ;;  %886 = vmatpush.bf16.msra.mxu0 %v2366_v29  ;;  %v2342_v47 = vor.u32 %v2718_v45, %v2341_v44  ;;  %v2343_v48 = vld [vmem:[#allocation10 + $0x6c] sm:$0xf0]  ;;  %v2349_v49 = vld [vmem:[#allocation10 + $0x68] sm:$0xf]  ;;  %s3444_s17 = smov 96  }
  0x67   : > { %661 = vadd.xlane.f32.xlu0 %v3705_v1  ;;  %900 = vmatpush.bf16.msra.mxu1 %v2370_v33  ;;  %v2719_v50 = vld [vmem:[#allocation10 + $0x70] sm:$0xf0]  ;;  %v2346_v51 = vor.u32 %v2717_v46, %v2343_v48  ;;  %v2329_v53 = vld [vmem:[#allocation10 + $0x48] sm:$0xf]  ;;  %v2714_v55 = vld [vmem:[#allocation10 + $0x4c] sm:$0xf] }
  0x68   : > { %v665_v5 = vsub.f32 1.0, %v664_v4  ;;  %914 = vmatpush.bf16.msra.mxu2 %v2374_v34  ;;  %v2350_v52 = vor.u32 %v2719_v50, %v2349_v49  ;;  %v2715_v54 = vld [vmem:[#allocation10 + $0x50] sm:$0xf0]  ;;  %v2331_v57 = vld [vmem:[#allocation10 + $0x54] sm:$0xf0]  ;;  %vm978_vm8 = vcmask 130048  }
  0x69   : > { %v2330_v56 = vor.u32 %v2715_v54, %v2329_v53  ;;  %v2337_v58 = vld [vmem:[#allocation10 + $0x50] sm:$0xf]  ;;  %v2716_v59 = vld [vmem:[#allocation10 + $0x58] sm:$0xf0]  ;;  %v2334_v60 = vor.u32 %v2714_v55, %v2331_v57  ;;  %v2711_v2 = vld [vmem:[#allocation10 + $0x34] sm:$0xf] }
  0x6a   : > { %v666_v6 = vmul.f32 %v2981_v3, %v665_v5  ;;  %887 = vmatpush.bf16.msra.mxu0 %v2354_v38  ;;  %v2338_v61 = vor.u32 %v2716_v59, %v2337_v58  ;;  %v2317_v62 = vld [vmem:[#allocation10 + $0x30] sm:$0xf]  ;;  %v2712_v63 = vld [vmem:[#allocation10 + $0x38] sm:$0xf0]  ;;  %v2319_v4 = vld [vmem:[#allocation10 + $0x3c] sm:$0xf0] }
  0x6b   : > { %901 = vmatpush.bf16.msra.mxu1 %v2358_v42  ;;  %v2325_v5 = vld [vmem:[#allocation10 + $0x38] sm:$0xf]  ;;  %v2313_v17 = vld [vmem:[#allocation10 + $0x20] sm:$0xf]  ;;  %v2710_v18 = vld [vmem:[#allocation10 + $0x28] sm:$0xf0] }
  0x6c   : > { %v667_v7 = vadd.f32 %v2981_v3, %v666_v6  ;;  %915 = vmatpush.bf16.msra.mxu2 %v2362_v43  ;;  %v2713_v6 = vld [vmem:[#allocation10 + $0x40] sm:$0xf0]  ;;  %v2314_v20 = vor.u32 %v2710_v18, %v2313_v17  ;;  %v2293_v21 = vld [vmem:[#allocation10] sm:$0xf]  ;;  %v2706_v22 = vld [vmem:[#allocation10 + $0x8] sm:$0xf0] }
  0x6d   : > { %v2705_v23 = vld [vmem:[#allocation10 + $0x4] sm:$0xf]  ;;  %v2294_v25 = vor.u32 %v2706_v22, %v2293_v21  ;;  %v2295_v26 = vld [vmem:[#allocation10 + $0xc] sm:$0xf0]  ;;  %v2301_v27 = vld [vmem:[#allocation10 + $0x8] sm:$0xf] }
  0x6e   : > { %v3708_v8 = vsel %vm668_vm0, %v2981_v3, %v667_v7  ;;  %888 = vmatpush.bf16.msra.mxu0 %v2342_v47  ;;  %v2318_v3 = vor.u32 %v2712_v63, %v2317_v62  ;;  %v2322_v7 = vor.u32 %v2711_v2, %v2319_v4  ;;  %v2707_v28 = vld [vmem:[#allocation10 + $0x10] sm:$0xf0]  ;;  %v2298_v30 = vor.u32 %v2705_v23, %v2295_v26  ;;  %v2972_v49 = vld [vmem:[#allocation7] ss:$0 sm:$0xff]  ;;  %v2973_v54 = vld [vmem:[#allocation9] ss:$0 sm:$0xff] }
  0x6f   : > { %902 = vmatpush.bf16.msra.mxu1 %v2346_v51  ;;  %v2302_v31 = vor.u32 %v2707_v28, %v2301_v27  ;;  %s3445_s28 = smov 32   ;;  %s3446_s16 = smov 64   ;;  %vm1263_vm9 = vcmask 523264   ;;  %vm1266_vm10 = vcmask 785408  }
  0x70   : > { %916 = vmatpush.bf16.msra.mxu2 %v2350_v52  ;;  %s3931_s30 = sld [smem:[#allocation34_spill]]  ;;  %s653_s22 = scalar_lea.vmem [#allocation21], %s2280_s5 }
  0x71   : > { %s3932_s29 = sld [smem:[#allocation35_spill]]  ;;  %s2102_s11 = sshll.u32 %s653_s22, 4  ;;  %s2103_s11 = int_to_ptr.vmem [resolvable:$true] %s2102_s11 }
  0x72   : > { %889 = vmatpush.bf16.msra.mxu0 %v2330_v56  ;;  %s3933_s14 = sld [smem:[#allocation36_spill]] }
  0x73   : > { %903 = vmatpush.bf16.msra.mxu1 %v2334_v60  ;;  %s3935_s3 = sld [smem:[#allocation38_spill]] }
  0x74   : > { %917 = vmatpush.bf16.msra.mxu2 %v2338_v61 }
  0x76   : > { %890 = vmatpush.bf16.msra.mxu0 %v2318_v3 }
  0x77   : > { %904 = vmatpush.bf16.msra.mxu1 %v2322_v7 }
  0x79   : > { %s3358_s2 = scalar_lea.hbm %s3935_s3, 32 }
  0xd2   : > { %v660_v9 = vpop.xlane.xlu0 %659 }
  0xd3   : > { %v670_v10 = vmul.f32 %v3708_v8, %v660_v9  ;;  %v2326_v9 = vor.u32 %v2713_v6, %v2325_v5 }
  0xd5   : > { %v3712_v11 = vsub.f32 %v3702_v0, %v670_v10  ;;  %918 = vmatpush.bf16.msra.mxu2 %v2326_v9  ;;  %v2305_v10 = vld [vmem:[#allocation10 + $0x18] sm:$0xf] }
  0xd7   : > { %v674_v12 = vmul.f32 %v3712_v11, %v3712_v11 }
  0xd9   : > { %676 = vadd.xlane.f32.xlu1 %v674_v12  ;;  %v2709_v12 = vld [vmem:[#allocation10 + $0x20] sm:$0xf0]  ;;  %919 = vmatpush.bf16.msra.mxu2 %v2314_v20 }
  0xda   : > { %v662_v13 = vpop.xlane.xlu0 %661 }
  0xdb   : > { %v671_v14 = vmul.f32 %v3708_v8, %v662_v13  ;;  %v2708_v13 = vld [vmem:[#allocation10 + $0x1c] sm:$0xf] }
  0xdd   : > { %v3718_v15 = vsub.f32 %v3705_v1, %v671_v14  ;;  %v2306_v14 = vor.u32 %v2709_v12, %v2305_v10  ;;  %920 = vmatpush.bf16.msra.mxu2 %v2302_v31 }
  0xdf   : > { %v675_v16 = vmul.f32 %v3718_v15, %v3718_v15  ;;  %891 = vmatpush.bf16.msra.mxu0 %v2306_v14 }
  0xe1   : > { %678 = vadd.xlane.f32.xlu1 %v675_v16  ;;  %v2307_v16 = vld [vmem:[#allocation10 + $0x24] sm:$0xf0] }
  0xe2   : > { %v2310_v19 = vor.u32 %v2708_v13, %v2307_v16 }
  0xe3   : > { %892 = vmatpush.bf16.msra.mxu0 %v2294_v25 }
  0xe4   : > { %905 = vmatpush.bf16.msra.mxu1 %v2310_v19 }
  0xe8   : > { %906 = vmatpush.bf16.msra.mxu1 %v2298_v30 }
 0x14c   : > { %v677_v24 = vpop.xlane.xlu1 %676 }
 0x14d   : > { %v680_v29 = vmul.f32 %v677_v24, %v3708_v8 }
 0x14f   : > { %v682_v32 = vadd.f32 1e-06, %v680_v29 }
 0x151   : > { %2982 = vrsqrt.f32 %v682_v32  ;;  %vm690_vm2 = vweird.f32 %v682_v32 }
 0x154   : > { %v679_v33 = vpop.xlane.xlu1 %678 }
 0x155   : > { %v681_v34 = vmul.f32 %v679_v33, %v3708_v8 }
 0x157   : > { %v2983_v35 = vpop.eup %2982  ;;  %v683_v36 = vadd.f32 1e-06, %v681_v34 }
 0x158   : > { %v685_v37 = vmul.f32 %v2983_v35, %v682_v32  ;;  %vm691_vm1 = vweird.f32 %v2983_v35 }
 0x159   : > { %2984 = vrsqrt.f32 %v683_v36  ;;  %vm692_vm3 = vmor %vm690_vm2, %vm691_vm1  ;;  %vm700_vm5 = vweird.f32 %v683_v36 }
 0x15a   : > { %v686_v38 = vmul.f32 %v2983_v35, %v685_v37 }
 0x15c   : > { %v687_v39 = vmul.f32 0.5, %v686_v38 }
 0x15e   : > { %v688_v40 = vsub.f32 1.5, %v687_v39 }
 0x15f   : > { %v2985_v41 = vpop.eup %2984 }
 0x160   : > { %v689_v42 = vmul.f32 %v2983_v35, %v688_v40  ;;  %v695_v43 = vmul.f32 %v2985_v41, %v683_v36  ;;  %vm701_vm4 = vweird.f32 %v2985_v41 }
 0x161   : > { %vm702_vm6 = vmor %vm700_vm5, %vm701_vm4 }
 0x162   : > { %v696_v44 = vmul.f32 %v2985_v41, %v695_v43  ;;  %v693_v45 = vsel %vm692_vm3, %v2983_v35, %v689_v42 }
 0x163   : > { %v704_v48 = vmul.f32 %v693_v45, %v3712_v11  ;;  %v749_v11 = vld [vmem:[%s3896_s4] sm:$0x7] }
 0x164   : > { %v697_v46 = vmul.f32 0.5, %v696_v44  ;;  %v751_v61 = vperm.slane %v749_v11, 0  ;;  %v752_v62 = vperm.slane %v749_v11, 1  ;;  %v753_v10 = vperm.slane %v749_v11, 2 }
 0x165   : > { %v709_v53 = vmul.f32 %v2972_v49, %v704_v48 }
 0x166   : > { %v698_v47 = vsub.f32 1.5, %v697_v46 }
 0x167   : > { %v714_v56 = vadd.f32 %v2973_v54, %v709_v53 }
 0x168   : > { %v699_v50 = vmul.f32 %v2985_v41, %v698_v47 }
 0x16a   : > { %v703_v51 = vsel %vm702_vm6, %v2985_v41, %v699_v50 }
 0x16b   : > { %v705_v52 = vmul.f32 %v703_v51, %v3718_v15 }
 0x16d   : > { %v710_v55 = vmul.f32 %v2972_v49, %v705_v52 }
 0x16f   : > { %v715_v57 = vadd.f32 %v2973_v54, %v710_v55 }
 0x171   : > { %v716_v58 = vpack.c.bf16 %v715_v57, %v714_v56 }
 0x173   : > { %893 = vmatmul.bf16.vlgmr.msra.gmra.mxu0 %v716_v58  ;;  %907 = vmatmul.bf16.vlgmr.msra.gmra.mxu1 %v716_v58 }
 0x174   : > { %921 = vmatmul.bf16.vlgmr.msra.gmra.mxu2 %v716_v58 }
 0x1f0   : > { %v894_v59 = vpop.f32.mrf.mxu0  ;;  %v908_v60 = vpop.f32.mrf.mxu1 }
 0x1f1   : > { %v895_v3 = vadd.f32 %v894_v59, %v751_v61  ;;  %v909_v4 = vadd.f32 %v908_v60, %v752_v62 }
 0x1f7   : > { %v922_v63 = vpop.f32.mrf.mxu2 }
 0x1f8   : > { %v896_v2 = vpop.f32.mrf.mxu0  ;;  %v910_v15 = vpop.f32.mrf.mxu1  ;;  %v923_v13 = vadd.f32 %v922_v63, %v753_v10 }
 0x1f9   : > { %v897_v5 = vadd.f32 %v896_v2, %v751_v61  ;;  %v911_v6 = vadd.f32 %v910_v15, %v752_v62 }
 0x1fb   : > { %v2809_v7 = vpack.c.bf16 %v897_v5, %v895_v3  ;;  %v2814_v9 = vpack.c.bf16 %v911_v6, %v909_v4 }
 0x1fd   : > { %2810 = vst [vmem:[#allocation2 + $0x10] sm:$0xff] %v2809_v7  }
 0x1fe   : > { %2815 = vst [vmem:[#allocation2] sm:$0xff] %v2814_v9  }
 0x1ff   : > { %v924_v12 = vpop.f32.mrf.mxu2 }
 0x200   : > { %v925_v14 = vadd.f32 %v924_v12, %v753_v10 }
 0x202   : > { %v2819_v16 = vpack.c.bf16 %v925_v14, %v923_v13 }
 0x204   : > { %2820 = vst [vmem:[#allocation2 + $0x8] sm:$0xff] %v2819_v16   ;;  %v2729_v17 = vld [vmem:[#allocation2 + $0x10] sm:$0xff] }
 0x205   : > { %v2730_v18 = vld [vmem:[#allocation2] sm:$0xff]  ;;  %1027 = vrot.lane.b32.xlu0 %v2729_v17, %s3444_s17 }
 0x206   : > { %v962_v19 = vsel %vm957_vm7, %v2730_v18, 0 }
 0x207   : > { %971 = vmatpush.bf16.xpose.msra.mxu3 %v962_v19 }
 0x20b   : > { %v3731_v20 = vld [vmem:[#allocation2 + $0x8] sm:$0xff] }
 0x20e   : > { %2395 = vmatmul.msk.bf16.vlgmr.msra.gmra.mxu3 %vm957_vm7, %v2729_v17 }
 0x20f   : > { %1018 = vmatpush.bf16.msrb.mxu3 %v3731_v20 }
 0x277   : > { %v1028_v37 = vpop.permute.xlu0 %1027 }
 0x291   : > { %v973_v21 = vpop.f32.mrf.mxu3 }
 0x292   : > { %v979_v22 = vsel %vm978_vm8, %v973_v21, -inf }
 0x293   : > { %980 = vmax.xlane.f32.xlu2 %v979_v22 }
 0x299   : > { %v975_v23 = vpop.f32.mrf.mxu3 }
 0x29a   : > { %v982_v24 = vsel %vm978_vm8, %v975_v23, -inf }
 0x29b   : > { %983 = vmax.xlane.f32.xlu2 %v982_v24 }
 0x2b3   : > { %1029 = vrot.lane.b32.xlu2 %v2730_v18, %s3444_s17 }
 0x2bb   : > { %1167 = vrot.lane.b32.xlu2 %v2730_v18, %s3445_s28 }
 0x2c3   : > { %1165 = vrot.lane.b32.xlu2 %v2729_v17, %s3445_s28 }
 0x306   : > { %v981_v25 = vpop.xlane.xlu2 %980 }
 0x307   : > { %v985_v26 = vsub.f32 %v973_v21, %v981_v25 }
 0x309   : > { %v987_v27 = vmul.f32 1.442695, %v985_v26 }
 0x30b   : > { %2986 = vpow2.f32 %v987_v27 }
 0x30e   : > { %v984_v28 = vpop.xlane.xlu2 %983 }
 0x30f   : > { %v986_v29 = vsub.f32 %v975_v23, %v984_v28 }
 0x311   : > { %v2987_v30 = vpop.eup %2986  ;;  %v989_v31 = vmul.f32 1.442695, %v986_v29 }
 0x312   : > { %v991_v32 = vsel %vm978_vm8, %v2987_v30, 0.0 }
 0x313   : > { %2988 = vpow2.f32 %v989_v31  ;;  %992 = vadd.xlane.f32.xlu0 %v991_v32 }
 0x316   : > { %v1030_v33 = vpop.permute.xlu2 %1029 }
 0x317   : > { %v1035_v34 = vsel %vm957_vm7, %v1030_v33, 0 }
 0x318   : > { %1044 = vmatpush.bf16.xpose.msra.mxu3 %v1035_v34 }
 0x319   : > { %v2989_v35 = vpop.eup %2988 }
 0x31a   : > { %v994_v36 = vsel %vm978_vm8, %v2989_v35, 0.0 }
 0x31b   : > { %995 = vadd.xlane.f32.xlu1 %v994_v36 }
 0x31e   : > { %v1168_v44 = vpop.permute.xlu2 %1167 }
 0x31f   : > { %v1173_v46 = vsel %vm957_vm7, %v1168_v44, 0 }
 0x326   : > { %v1166_v50 = vpop.permute.xlu2 %1165 }
 0x327   : > { %1096 = vrot.lane.b32.xlu0 %v2729_v17, %s3446_s16 }
 0x334   : > { %1098 = vrot.lane.b32.xlu1 %v2730_v18, %s3446_s16 }
 0x386   : > { %v993_v38 = vpop.xlane.xlu0 %992 }
 0x387   : > { %2990 = vrcp.f32 %v993_v38 }
 0x38d   : > { %v2991_v40 = vpop.eup %2990 }
 0x38e   : > { %v996_v39 = vpop.xlane.xlu1 %995  ;;  %v999_v42 = vmul.f32 %v2991_v40, %v2987_v30 }
 0x38f   : > { %2992 = vrcp.f32 %v996_v39 }
 0x395   : > { %v2993_v41 = vpop.eup %2992 }
 0x396   : > { %v1000_v43 = vmul.f32 %v2993_v41, %v2989_v35 }
 0x398   : > { %v1001_v45 = vpack.c.bf16 %v1000_v43, %v999_v42 }
 0x399   : > { %v1097_v49 = vpop.permute.xlu0 %1096 }
 0x39a   : > { %2400 = vmatmul.msk.bf16.vlgmr.msrb.gmra.mxu3 %vm978_vm8, %v1001_v45 }
 0x39b   : > { %1182 = vmatpush.bf16.xpose.msrb.mxu3 %v1173_v46 }
 0x3a6   : > { %v1099_v47 = vpop.permute.xlu1 %1098 }
 0x3a7   : > { %v1104_v48 = vsel %vm957_vm7, %v1099_v47, 0 }
 0x3a8   : > { %1113 = vmatpush.bf16.xpose.msrb.mxu2 %v1104_v48 }
 0x3aa   : > { %2401 = vmatmul.msk.bf16.vlgmr.msra.gmra.mxu3 %vm957_vm7, %v1028_v37 }
 0x3af   : > { %2403 = vmatmul.msk.bf16.vlgmr.msrb.gmra.mxu2 %vm957_vm7, %v1097_v49 }
 0x3ba   : > { %2405 = vmatmul.msk.bf16.vlgmr.msrb.gmra.mxu3 %vm957_vm7, %v1166_v50 }
 0x41d   : > { %v1020_v51 = vpop.f32.mrf.mxu3 }
 0x41e   : > { %v1025_v52 = vpack.c.bf16 %v1020_v51, %v1020_v51 }
 0x420   : > { %v3751_v55 = vunpack.c.l.b16 %v1025_v52 }
 0x425   : > { %v1022_v53 = vpop.f32.mrf.mxu3 }
 0x426   : > { %v1026_v54 = vpack.c.bf16 %v1022_v53, %v1022_v53 }
 0x428   : > { %v3753_v56 = vunpack.c.l.b16 %v1026_v54 }
 0x42a   : > { %v1238_v57 = vpack.c.b16 %v3753_v56, %v3751_v55 }
 0x42d   : > { %v1046_v58 = vpop.f32.mrf.mxu3 }
 0x42e   : > { %v1051_v59 = vsel %vm978_vm8, %v1046_v58, -inf }
 0x42f   : > { %1052 = vmax.xlane.f32.xlu1 %v1051_v59 }
 0x432   : > { %v1115_v60 = vpop.f32.mrf.mxu2 }
 0x433   : > { %v1120_v11 = vsel %vm978_vm8, %v1115_v60, -inf }
 0x434   : > { %1121 = vmax.xlane.f32.xlu2 %v1120_v11 }
 0x435   : > { %v1048_v61 = vpop.f32.mrf.mxu3 }
 0x436   : > { %v1054_v62 = vsel %vm978_vm8, %v1048_v61, -inf }
 0x437   : > { %1055 = vmax.xlane.f32.xlu0 %v1054_v62 }
 0x43a   : > { %v1117_v63 = vpop.f32.mrf.mxu2 }
 0x43b   : > { %v1123_v2 = vsel %vm978_vm8, %v1117_v63, -inf }
 0x43c   : > { %1124 = vmax.xlane.f32.xlu1 %v1123_v2 }
 0x43d   : > { %v1184_v15 = vpop.f32.mrf.mxu3 }
 0x43e   : > { %v1189_v3 = vsel %vm978_vm8, %v1184_v15, -inf }
 0x43f   : > { %1190 = vmax.xlane.f32.xlu0 %v1189_v3 }
 0x445   : > { %v1186_v4 = vpop.f32.mrf.mxu3 }
 0x446   : > { %v1192_v5 = vsel %vm978_vm8, %v1186_v4, -inf }
 0x447   : > { %1193 = vmax.xlane.f32.xlu2 %v1192_v5 }
 0x45f   : > { %1074 = vrot.lane.b32.xlu2 %v3731_v20, %s3444_s17 }
 0x4a2   : > { %v1053_v6 = vpop.xlane.xlu1 %1052 }
 0x4a3   : > { %v1057_v10 = vsub.f32 %v1046_v58, %v1053_v6 }
 0x4a5   : > { %v1059_v14 = vmul.f32 1.442695, %v1057_v10 }
 0x4a7   : > { %v1122_v7 = vpop.xlane.xlu2 %1121 }
 0x4a8   : > { %v1126_v9 = vsub.f32 %v1115_v60, %v1122_v7 }
 0x4aa   : > { %v1128_v12 = vmul.f32 1.442695, %v1126_v9  ;;  %v1056_v13 = vpop.xlane.xlu0 %1055 }
 0x4ab   : > { %v1058_v18 = vsub.f32 %v1048_v61, %v1056_v13 }
 0x4ac   : > { %2994 = vpow2.f32 %v1128_v12 }
 0x4ad   : > { %2996 = vpow2.f32 %v1059_v14  ;;  %v1061_v25 = vmul.f32 1.442695, %v1058_v18 }
 0x4af   : > { %v1125_v16 = vpop.xlane.xlu1 %1124 }
 0x4b0   : > { %v1127_v17 = vsub.f32 %v1117_v63, %v1125_v16 }
 0x4b2   : > { %v2995_v19 = vpop.eup %2994  ;;  %v1130_v21 = vmul.f32 1.442695, %v1127_v17  ;;  %v1191_v22 = vpop.xlane.xlu0 %1190 }
 0x4b3   : > { %v1195_v23 = vsub.f32 %v1184_v15, %v1191_v22  ;;  %v1132_v24 = vsel %vm978_vm8, %v2995_v19, 0.0  ;;  %v2997_v27 = vpop.eup %2996 }
 0x4b4   : > { %2998 = vpow2.f32 %v1130_v21  ;;  %1133 = vadd.xlane.f32.xlu1 %v1132_v24  ;;  %v1063_v32 = vsel %vm978_vm8, %v2997_v27, 0.0 }
 0x4b5   : > { %v1197_v26 = vmul.f32 1.442695, %v1195_v23  ;;  %3000 = vpow2.f32 %v1061_v25 }
 0x4b7   : > { %3002 = vpow2.f32 %v1197_v26 }
 0x4ba   : > { %v2999_v28 = vpop.eup %2998  ;;  %v1194_v29 = vpop.xlane.xlu2 %1193 }
 0x4bb   : > { %v1196_v30 = vsub.f32 %v1186_v4, %v1194_v29  ;;  %v1135_v31 = vsel %vm978_vm8, %v2999_v28, 0.0  ;;  %v3001_v34 = vpop.eup %3000  ;;  %v2738_v29 = vld [vmem:[#allocation12 + $0x28] sm:$0xff] }
 0x4bc   : > { %1136 = vadd.xlane.f32.xlu0 %v1135_v31  ;;  %1064 = vadd.xlane.f32.xlu1 %v1063_v32  ;;  %v1066_v37 = vsel %vm978_vm8, %v3001_v34, 0.0  ;;  %v2736_v31 = vld [vmem:[#allocation12 + $0x18] sm:$0xff]  ;;  %v2735_v32 = vld [vmem:[#allocation12 + $0x10] sm:$0xff] }
 0x4bd   : > { %v1199_v33 = vmul.f32 1.442695, %v1196_v30  ;;  %v3003_v35 = vpop.eup %3002  ;;  %v2737_v30 = vld [vmem:[#allocation12 + $0x20] sm:$0xff] }
 0x4be   : > { %v1201_v38 = vsel %vm978_vm8, %v3003_v35, 0.0 }
 0x4bf   : > { %3004 = vpow2.f32 %v1199_v33  ;;  %v2734_v33 = vld [vmem:[#allocation12 + $0x8] sm:$0xff] }
 0x4c2   : > { %v1075_v36 = vpop.permute.xlu2 %1074 }
 0x4c3   : > { %1087 = vmatpush.bf16.msrb.mxu0 %v1075_v36 }
 0x4c4   : > { %1067 = vadd.xlane.f32.xlu0 %v1066_v37  ;;  %1202 = vadd.xlane.f32.xlu1 %v1201_v38 }
 0x4c5   : > { %v3005_v39 = vpop.eup %3004 }
 0x4c6   : > { %v1204_v40 = vsel %vm978_vm8, %v3005_v39, 0.0 }
 0x4cc   : > { %1205 = vadd.xlane.f32.xlu0 %v1204_v40 }
 0x4dd   : > { %1143 = vrot.lane.b32.xlu1 %v3731_v20, %s3446_s16 }
 0x4e0   : > { %1212 = vrot.lane.b32.xlu0 %v3731_v20, %s3445_s28 }
 0x527   : > { %v1134_v41 = vpop.xlane.xlu1 %1133 }
 0x52f   : > { %v1137_v42 = vpop.xlane.xlu0 %1136  ;;  %v1065_v43 = vpop.xlane.xlu1 %1064 }
 0x530   : > { %3006 = vrcp.f32 %v1065_v43 }
 0x536   : > { %v3007_v45 = vpop.eup %3006 }
 0x537   : > { %v1068_v44 = vpop.xlane.xlu0 %1067  ;;  %v1071_v47 = vmul.f32 %v3007_v45, %v2997_v27  ;;  %v1203_v51 = vpop.xlane.xlu1 %1202  ;;  %v2740_v27 = vld [vmem:[#allocation12 + $0x38] sm:$0xff] }
 0x538   : > { %3008 = vrcp.f32 %v1068_v44  ;;  %1354 = vmatpush.bf16.msrb.mxu1 %v2740_v27  ;;  %v2761_v27 = vld [vmem:[#allocation18 + $0xa4] sm:$0xf] }
 0x539   : > { %3010 = vrcp.f32 %v1137_v42 }
 0x53a   : > { %3012 = vrcp.f32 %v1134_v41 }
 0x53e   : > { %v3009_v46 = vpop.eup %3008 }
 0x53f   : > { %v1072_v48 = vmul.f32 %v3009_v46, %v3001_v34  ;;  %v1206_v50 = vpop.xlane.xlu0 %1205  ;;  %v3011_v20 = vpop.eup %3010  ;;  %v2733_v34 = vld [vmem:[#allocation12] sm:$0xff] }
 0x540   : > { %3014 = vrcp.f32 %v1206_v50  ;;  %v3013_v52 = vpop.eup %3012  ;;  %v1141_v54 = vmul.f32 %v3011_v20, %v2999_v28  ;;  %v2739_v28 = vld [vmem:[#allocation12 + $0x30] sm:$0xff]  ;;  %v2974_v46 = vld [vmem:[#allocation13] ss:$0 sm:$0xff] }
 0x541   : > { %v1073_v49 = vpack.c.bf16 %v1072_v48, %v1071_v47  ;;  %3016 = vrcp.f32 %v1203_v51  ;;  %v1140_v59 = vmul.f32 %v3013_v52, %v2995_v19  ;;  %1355 = vmatpush.bf16.msrb.mxu1 %v2739_v28  ;;  %v2975_v47 = vld [vmem:[#allocation15] ss:$0 sm:$0xff] }
 0x543   : > { %2402 = vmatmul.msk.bf16.vlgmr.msrb.gmra.mxu0 %vm978_vm8, %v1073_v49  ;;  %v1142_v61 = vpack.c.bf16 %v1141_v54, %v1140_v59 }
 0x545   : > { %1356 = vmatpush.bf16.msrb.mxu1 %v2738_v29  ;;  %v2527_v29 = vld [vmem:[#allocation18 + $0xb0] sm:$0xf0] }
 0x546   : > { %v3015_v53 = vpop.eup %3014 }
 0x547   : > { %v3017_v58 = vpop.eup %3016  ;;  %v1210_v11 = vmul.f32 %v3015_v53, %v3005_v39 }
 0x548   : > { %v1209_v62 = vmul.f32 %v3017_v58, %v3003_v35 }
 0x549   : > { %1357 = vmatpush.bf16.msrb.mxu1 %v2737_v30  ;;  %v2533_v30 = vld [vmem:[#allocation18 + $0xa8] sm:$0xf] }
 0x54a   : > { %v1211_v2 = vpack.c.bf16 %v1210_v11, %v1209_v62  ;;  %v2557_v11 = vld [vmem:[#allocation18 + $0xe0] sm:$0xf]  ;;  %v2769_v62 = vld [vmem:[#allocation18 + $0xe4] sm:$0xf] }
 0x54d   : > { %1358 = vmatpush.bf16.msrb.mxu1 %v2736_v31  ;;  %v2764_v31 = vld [vmem:[#allocation18 + $0xb4] sm:$0xf0] }
 0x54f   : > { %v1144_v60 = vpop.permute.xlu1 %1143 }
 0x550   : > { %1156 = vmatpush.bf16.msra.mxu2 %v1144_v60 }
 0x551   : > { %1359 = vmatpush.bf16.msrb.mxu1 %v2735_v32  ;;  %v2530_v32 = vor.u32 %v2761_v27, %v2527_v29  ;;  %v2741_v29 = vld [vmem:[#allocation18 + $0x4] sm:$0xf] }
 0x552   : > { %v1213_v63 = vpop.permute.xlu0 %1212 }
 0x553   : > { %2404 = vmatmul.msk.bf16.vlgmr.msra.gmra.mxu2 %vm978_vm8, %v1142_v61  ;;  %1225 = vmatpush.bf16.msra.mxu0 %v1213_v63  ;;  %v2771_v61 = vld [vmem:[#allocation18 + $0xec] sm:$0xf0] }
 0x554   : > { %v2558_v63 = vor.u32 %v2771_v61, %v2557_v11  ;;  %v2477_v61 = vld [vmem:[#allocation18 + $0x40] sm:$0xf] }
 0x555   : > { %1360 = vmatpush.bf16.msrb.mxu1 %v2734_v33  ;;  %v2534_v33 = vor.u32 %v2764_v31, %v2533_v30  ;;  %v2447_v30 = vld [vmem:[#allocation18 + $0x10] sm:$0xf0] }
 0x556   : > { %2406 = vmatmul.msk.bf16.vlgmr.msra.gmra.mxu0 %vm978_vm8, %v1211_v2  ;;  %v2559_v2 = vld [vmem:[#allocation18 + $0xf0] sm:$0xf0]  ;;  %1631 = vmatpush.bf16.msrb.mxu2 %v2558_v63  ;;  %v2749_v63 = vld [vmem:[#allocation18 + $0x44] sm:$0xf] }
 0x559   : > { %1361 = vmatpush.bf16.msrb.mxu1 %v2733_v34  ;;  %v2762_v34 = vld [vmem:[#allocation18 + $0xac] sm:$0xf] }
 0x5c0   : > { %v1089_v15 = vpop.f32.mrf.mxu0 }
 0x5c1   : > { %v1094_v16 = vpack.c.bf16 %v1089_v15, %v1089_v15  ;;  %v2565_v15 = vld [vmem:[#allocation18 + $0xe8] sm:$0xf] }
 0x5c3   : > { %v1241_v19 = vunpack.c.l.b16 %v1094_v16  ;;  %v2543_v16 = vld [vmem:[#allocation18 + $0xd0] sm:$0xf0] }
 0x5c8   : > { %v1091_v3 = vpop.f32.mrf.mxu0 }
 0x5c9   : > { %v1095_v13 = vpack.c.bf16 %v1091_v3, %v1091_v3  ;;  %v2772_v3 = vld [vmem:[#allocation18 + $0xf4] sm:$0xf0] }
 0x5cb   : > { %v1242_v17 = vunpack.c.l.b16 %v1095_v13  ;;  %v2765_v13 = vld [vmem:[#allocation18 + $0xc4] sm:$0xf] }
 0x5cd   : > { %v1243_v21 = vpack.c.b16 %v1242_v17, %v1241_v19  ;;  %v2549_v17 = vld [vmem:[#allocation18 + $0xc8] sm:$0xf]  ;;  %v2546_v19 = vor.u32 %v2765_v13, %v2543_v16  ;;  %v2747_v13 = vld [vmem:[#allocation18 + $0x2c] sm:$0xf0] }
 0x5d3   : > { %v1227_v6 = vpop.f32.mrf.mxu0 }
 0x5d4   : > { %v1232_v23 = vpack.c.bf16 %v1227_v6, %v1227_v6  ;;  %v2770_v6 = vld [vmem:[#allocation18 + $0xec] sm:$0xf] }
 0x5d6   : > { %v1158_v4 = vpop.f32.mrf.mxu2  ;;  %v1255_v25 = vunpack.c.l.b16 %v1232_v23  ;;  %v2551_v23 = vld [vmem:[#allocation18 + $0xd8] sm:$0xf0] }
 0x5d7   : > { %v1163_v5 = vpack.c.bf16 %v1158_v4, %v1158_v4  ;;  %v2562_v4 = vor.u32 %v2769_v62, %v2559_v2  ;;  %v2751_v62 = vld [vmem:[#allocation18 + $0x4c] sm:$0xf0] }
 0x5d8   : > { %v2478_v2 = vor.u32 %v2751_v62, %v2477_v61  ;;  %v2977_v61 = vld [vmem:[%s3931_s30] ss:$0 sm:$0xff] }
 0x5d9   : > { %v1248_v10 = vunpack.c.l.b16 %v1163_v5  ;;  %v2566_v5 = vor.u32 %v2772_v3, %v2565_v15  ;;  %1645 = vmatpush.bf16.msra.mxu3 %v2562_v4  ;;  %v2479_v15 = vld [vmem:[#allocation18 + $0x50] sm:$0xf0]  ;;  %v2485_v3 = vld [vmem:[#allocation18 + $0x48] sm:$0xf]  ;;  %v2752_v4 = vld [vmem:[#allocation18 + $0x54] sm:$0xf0] }
 0x5db   : > { %v1229_v18 = vpop.f32.mrf.mxu0  ;;  %1659 = vmatpush.bf16.msrb.mxu0 %v2566_v5  ;;  %v2482_v5 = vor.u32 %v2749_v63, %v2479_v15 }
 0x5dc   : > { %v1233_v22 = vpack.c.bf16 %v1229_v18, %v1229_v18  ;;  %v2768_v18 = vld [vmem:[#allocation18 + $0xd4] sm:$0xf0] }
 0x5dd   : > { %1646 = vmatpush.bf16.msra.mxu3 %v2546_v19  ;;  %v2748_v19 = vld [vmem:[#allocation18 + $0x34] sm:$0xf0] }
 0x5de   : > { %v1160_v7 = vpop.f32.mrf.mxu2  ;;  %v1256_v24 = vunpack.c.l.b16 %v1233_v22  ;;  %v2766_v22 = vld [vmem:[#allocation18 + $0xcc] sm:$0xf] }
 0x5df   : > { %v1164_v9 = vpack.c.bf16 %v1160_v7, %v1160_v7  ;;  %v2567_v7 = vld [vmem:[#allocation18 + $0xf8] sm:$0xf0] }
 0x5e0   : > { %v1257_v26 = vpack.c.b16 %v1256_v24, %v1255_v25  ;;  %v2554_v24 = vor.u32 %v2766_v22, %v2551_v23  ;;  %v2525_v25 = vld [vmem:[#allocation18 + $0xa0] sm:$0xf]  ;;  %v2746_v23 = vld [vmem:[#allocation18 + $0x2c] sm:$0xf] }
 0x5e1   : > { %v1249_v12 = vunpack.c.l.b16 %v1164_v9  ;;  %v2570_v9 = vor.u32 %v2770_v6, %v2567_v7  ;;  %1647 = vmatpush.bf16.msra.mxu3 %v2530_v32  ;;  %v2486_v6 = vor.u32 %v2752_v4, %v2485_v3  ;;  %v2750_v7 = vld [vmem:[#allocation18 + $0x4c] sm:$0xf]  ;;  %v2804_v3 = vld [vmem:[#allocation19 + $0xf8] sm:$0xff]  ;;  %v2795_v4 = vld [vmem:[#allocation19 + $0xb0] sm:$0xff] }
 0x5e3   : > { %v1250_v14 = vpack.c.b16 %v1249_v12, %v1248_v10  ;;  %v2541_v10 = vld [vmem:[#allocation18 + $0xc0] sm:$0xf]  ;;  %v2767_v12 = vld [vmem:[#allocation18 + $0xcc] sm:$0xf0]  ;;  %1673 = vmatpush.bf16.msra.mxu1 %v2570_v9  ;;  %v2487_v9 = vld [vmem:[#allocation18 + $0x58] sm:$0xf0] }
 0x5e5   : > { %1251 = vrot.lane.b32.xlu2 %v1250_v14, %s3446_s16  ;;  %v2542_v14 = vor.u32 %v2767_v12, %v2541_v10  ;;  %v2490_v10 = vor.u32 %v2750_v7, %v2487_v9  ;;  %v2461_v12 = vld [vmem:[#allocation18 + $0x20] sm:$0xf]  ;;  %v2794_v7 = vld [vmem:[#allocation19 + $0xa8] sm:$0xff] }
 0x5e6   : > { %v2462_v16 = vor.u32 %v2747_v13, %v2461_v12  ;;  %v2802_v9 = vld [vmem:[#allocation19 + $0xe8] sm:$0xff]  ;;  %v2787_v12 = vld [vmem:[#allocation19 + $0x70] sm:$0xff]  ;;  %v2793_v13 = vld [vmem:[#allocation19 + $0xa0] sm:$0xff] }
 0x5e7   : > { %1632 = vmatpush.bf16.msrb.mxu2 %v2542_v14  ;;  %1674 = vmatpush.bf16.msra.mxu1 %v2554_v24  ;;  %v2745_v14 = vld [vmem:[#allocation18 + $0x24] sm:$0xf]  ;;  %v2471_v24 = vld [vmem:[#allocation18 + $0x38] sm:$0xf0] }
 0x5e8   : > { %v2474_v27 = vor.u32 %v2746_v23, %v2471_v24  ;;  %v2791_v23 = vld [vmem:[#allocation19 + $0x90] sm:$0xff] }
 0x5e9   : > { %v2799_v24 = vld [vmem:[#allocation19 + $0xd0] sm:$0xff] }
 0x5ed   : > { %1244 = vrot.lane.b32.xlu2 %v1243_v21, %s3445_s28  ;;  %v2550_v21 = vor.u32 %v2768_v18, %v2549_v17  ;;  %v2463_v17 = vld [vmem:[#allocation18 + $0x30] sm:$0xf0]  ;;  %v2469_v18 = vld [vmem:[#allocation18 + $0x28] sm:$0xf]  ;;  %s2805_s28 = sshll.u32 %s3553_s25, 4  ;;  %s2090_s25 = scalar_lea.sflag [#allocation6], %s3672_s23 }
 0x5ee   : > { %v2470_v22 = vor.u32 %v2748_v19, %v2469_v18  ;;  %v2792_v18 = vld [vmem:[#allocation19 + $0x98] sm:$0xff]  ;;  %s2101_s30 = scalar_lea.hbm %s3935_s3, %s2805_s28 }
 0x5ef   : > { %1660 = vmatpush.bf16.msrb.mxu0 %v2550_v21  ;;  %v2466_v21 = vor.u32 %v2745_v14, %v2463_v17  ;;  %v2801_v14 = vld [vmem:[#allocation19 + $0xe0] sm:$0xff]  ;;  %v2786_v17 = vld [vmem:[#allocation19 + $0x68] sm:$0xff]  ;;  %v2800_v19 = vld [vmem:[#allocation19 + $0xd8] sm:$0xff] }
 0x5f3   : > { %1661 = vmatpush.bf16.msrb.mxu0 %v2534_v33  ;;  %v2450_v33 = vor.u32 %v2741_v29, %v2447_v30  ;;  %v3815_v29 = vld [vmem:[%s3932_s29] sm:$0xf]  ;;  %s2104_s29 = sshll.u32 %s2101_s30, 4  ;;  %s2105_s29 = int_to_ptr.hbm [resolvable:$true] %s2104_s29 }
 0x5f4   : > { %v2775_v30 = vld [vmem:[#allocation19 + $0x10] sm:$0xff]  ;;  %s3352_s24 = sshra.s32 %s2105_s29, 4  ;;  %s3353_s24 = int_to_ptr.hbm [resolvable:$true] %s3352_s24 }
 0x5f5   : > { %1258 = vrot.lane.b32.xlu2 %v1257_v26, %s3444_s17  ;;  %v2763_v26 = vld [vmem:[#allocation18 + $0xac] sm:$0xf0]  ;;  %s3934_s17 = sld [smem:[#allocation37_spill]]  ;;  %s3354_s6 = scalar_lea.hbm %s3353_s24, 16 }
 0x5f6   : > { %v2526_v28 = vor.u32 %v2763_v26, %v2525_v25  ;;  %v2445_v25 = vld [vmem:[#allocation18] sm:$0xf]  ;;  %p3355_p1 = scmp.ne.s32.totalorder %s3353_s24, %s3354_s6  ;;  %p3359_p13 = scmp.lt.s32.totalorder %s3353_s24, %s3935_s3 }
 0x5f7   : > { %p3360_p7 = scmp.lt.s32.totalorder %s3358_s2, %s3354_s6 }
 0x5f8   : > { %1633 = vmatpush.bf16.msrb.mxu2 %v2526_v28  ;;  %v2743_v28 = vld [vmem:[#allocation18 + $0xc] sm:$0xf0]  ;;  %p3356_p3 = pnand %p3355_p1, %p3639_p0 }
 0x5f9   : > { %v2446_v32 = vor.u32 %v2743_v28, %v2445_v25  ;;  %v2776_v25 = vld [vmem:[#allocation19 + $0x18] sm:$0xff]  ;;  %v2798_v28 = vld [vmem:[#allocation19 + $0xc8] sm:$0xff]  ;;  %p3361_p8 = por %p3360_p7, %p3359_p13 }
 0x5fa   : > { %p3357_p4 = pneg %p3356_p3 }
 0x5fc   : > { %p3362_p9 = pnand %p3361_p8, %p3357_p4 }
 0x63f   : > { %v1252_v35 = vpop.permute.xlu2 %1251 }
 0x647   : > { %v1245_v36 = vpop.permute.xlu2 %1244 }
 0x648   : > { %v1262_v37 = vsel %vm957_vm7, %v1238_v57, %v1245_v36 }
 0x649   : > { %v1265_v38 = vsel %vm1263_vm9, %v1262_v37, %v1252_v35  ;;  %v2535_v35 = vld [vmem:[#allocation18 + $0xb8] sm:$0xf0]  ;;  %v2509_v37 = vld [vmem:[#allocation18 + $0x80] sm:$0xf] }
 0x64a   : > { %v2538_v36 = vor.u32 %v2762_v34, %v2535_v35  ;;  %v2453_v34 = vld [vmem:[#allocation18 + $0x8] sm:$0xf]  ;;  %v2744_v35 = vld [vmem:[#allocation18 + $0x14] sm:$0xf0] }
 0x64c   : > { %1675 = vmatpush.bf16.msra.mxu1 %v2538_v36  ;;  %v2742_v36 = vld [vmem:[#allocation18 + $0xc] sm:$0xf] }
 0x64f   : > { %v1259_v39 = vpop.permute.xlu2 %1258 }
 0x650   : > { %v1268_v40 = vsel %vm1266_vm10, %v1265_v38, %v1259_v39  ;;  %v2759_v38 = vld [vmem:[#allocation18 + $0x8c] sm:$0xf0]  ;;  %v2757_v39 = vld [vmem:[#allocation18 + $0x84] sm:$0xf] }
 0x651   : > { %v1270_v41 = vunpack.c.l.b16 %v1268_v40  ;;  %v1271_v42 = vunpack.c.h.b16 %v1268_v40  ;;  %v2510_v40 = vor.u32 %v2759_v38, %v2509_v37  ;;  %v2454_v37 = vor.u32 %v2744_v35, %v2453_v34  ;;  %v2455_v38 = vld [vmem:[#allocation18 + $0x18] sm:$0xf0] }
 0x652   : > { %v1465_v34 = vperm.slane %v3815_v29, 2  ;;  %v1466_v35 = vperm.slane %v3815_v29, 3 }
 0x653   : > { %v1272_v43 = vpack.c.b16 %v1270_v41, %v1270_v41  ;;  %v1273_v44 = vpack.c.b16 %v1271_v42, %v1271_v42  ;;  %v2511_v41 = vld [vmem:[#allocation18 + $0x90] sm:$0xf0]  ;;  %v2517_v42 = vld [vmem:[#allocation18 + $0x88] sm:$0xf]  ;;  %1634 = vmatpush.bf16.msrb.mxu2 %v2510_v40  ;;  %v2458_v40 = vor.u32 %v2742_v36, %v2455_v38 }
 0x654   : > { %v2774_v36 = vld [vmem:[#allocation19 + $0x8] sm:$0xff] }
 0x655   : > { %1276 = vst [vmem:[#allocation3] sm:$0xf] %v1272_v43  ;;  %v2760_v43 = vld [vmem:[#allocation18 + $0x94] sm:$0xf0] }
 0x656   : > { %1277 = vst [vmem:[#allocation3 + $0x4] sm:$0xf] %v1273_v44  ;;  %v2514_v44 = vor.u32 %v2757_v39, %v2511_v41 }
 0x658   : > { %1648 = vmatpush.bf16.msra.mxu3 %v2514_v44 }
 0x65d   : > { %v2732_v45 = vld [vmem:[#allocation3] sm:$0xff] }
 0x65e   : > { %1362 = vmatmul.bf16.vlgmr.msrb.gmra.mxu1 %v2732_v45  ;;  %v2518_v45 = vor.u32 %v2760_v43, %v2517_v42 }
 0x660   : > { %1662 = vmatpush.bf16.msrb.mxu0 %v2518_v45 }
 0x6db   : > { %v1363_v48 = vpop.f32.mrf.mxu1 }
 0x6dc   : > { %v1364_v49 = vadd.f32 %v2974_v46, %v1363_v48 }
 0x6de   : > { %v1372_v55 = vmul.f32 %v2975_v47, %v1364_v49  ;;  %v2493_v49 = vld [vmem:[#allocation18 + $0x60] sm:$0xf] }
 0x6e0   : > { %v3786_v56 = vadd.f32 %v1372_v55, %v3702_v0  ;;  %v2755_v55 = vld [vmem:[#allocation18 + $0x6c] sm:$0xf0] }
 0x6e2   : > { %1378 = vadd.xlane.f32.xlu0 %v3786_v56 }
 0x6e3   : > { %v1365_v57 = vpop.f32.mrf.mxu1 }
 0x6e4   : > { %v1366_v50 = vadd.f32 %v2974_v46, %v1365_v57  ;;  %v2758_v46 = vld [vmem:[#allocation18 + $0x8c] sm:$0xf]  ;;  %v2753_v57 = vld [vmem:[#allocation18 + $0x64] sm:$0xf] }
 0x6e6   : > { %v1373_v51 = vmul.f32 %v2975_v47, %v1366_v50  ;;  %v2519_v47 = vld [vmem:[#allocation18 + $0x98] sm:$0xf0]  ;;  %v2494_v50 = vor.u32 %v2755_v55, %v2493_v49 }
 0x6e7   : > { %v2522_v48 = vor.u32 %v2758_v46, %v2519_v47 }
 0x6e8   : > { %v3790_v20 = vadd.f32 %v1373_v51, %v3705_v1  ;;  %v2495_v51 = vld [vmem:[#allocation18 + $0x70] sm:$0xf0]  ;;  %1635 = vmatpush.bf16.msrb.mxu2 %v2494_v50 }
 0x6e9   : > { %1676 = vmatpush.bf16.msra.mxu1 %v2522_v48 }
 0x6ea   : > { %1380 = vadd.xlane.f32.xlu1 %v3790_v20 }
 0x6ec   : > { %1636 = vmatpush.bf16.msrb.mxu2 %v2478_v2 }
 0x6f0   : > { %1637 = vmatpush.bf16.msrb.mxu2 %v2462_v16  ;;  %v2778_v16 = vld [vmem:[#allocation19 + $0x28] sm:$0xff] }
 0x6f4   : > { %1638 = vmatpush.bf16.msrb.mxu2 %v2446_v32  ;;  %v2789_v32 = vld [vmem:[#allocation19 + $0x80] sm:$0xff] }
 0x755   : > { %v1379_v52 = vpop.xlane.xlu0 %1378 }
 0x756   : > { %v1382_v53 = vmul.f32 %v1379_v52, %v3708_v8  ;;  %v2501_v52 = vld [vmem:[#allocation18 + $0x68] sm:$0xf] }
 0x758   : > { %v3795_v54 = vsub.f32 %v3786_v56, %v1382_v53  ;;  %v2756_v53 = vld [vmem:[#allocation18 + $0x74] sm:$0xf0] }
 0x75a   : > { %v1386_v0 = vmul.f32 %v3795_v54, %v3795_v54 }
 0x75c   : > { %1388 = vadd.xlane.f32.xlu2 %v1386_v0  ;;  %v2498_v0 = vor.u32 %v2753_v57, %v2495_v51 }
 0x75d   : > { %v1381_v58 = vpop.xlane.xlu1 %1380 }
 0x75e   : > { %v1383_v59 = vmul.f32 %v1381_v58, %v3708_v8  ;;  %v2502_v58 = vor.u32 %v2756_v53, %v2501_v52  ;;  %1649 = vmatpush.bf16.msra.mxu3 %v2498_v0  ;;  %v2976_v0 = vld [vmem:[#allocation16] ss:$0 sm:$0xff] }
 0x760   : > { %v3801_v60 = vsub.f32 %v3790_v20, %v1383_v59  ;;  %v2754_v59 = vld [vmem:[#allocation18 + $0x6c] sm:$0xf]  ;;  %1663 = vmatpush.bf16.msrb.mxu0 %v2502_v58 }
 0x762   : > { %v1387_v1 = vmul.f32 %v3801_v60, %v3801_v60  ;;  %1650 = vmatpush.bf16.msra.mxu3 %v2482_v5  ;;  %v2803_v5 = vld [vmem:[#allocation19 + $0xf0] sm:$0xff] }
 0x764   : > { %1390 = vadd.xlane.f32.xlu0 %v1387_v1  ;;  %v2503_v1 = vld [vmem:[#allocation18 + $0x78] sm:$0xf0]  ;;  %1664 = vmatpush.bf16.msrb.mxu0 %v2486_v6 }
 0x765   : > { %v2506_v11 = vor.u32 %v2754_v59, %v2503_v1  ;;  %v2788_v6 = vld [vmem:[#allocation19 + $0x78] sm:$0xff] }
 0x766   : > { %1651 = vmatpush.bf16.msra.mxu3 %v2466_v21  ;;  %v2777_v21 = vld [vmem:[#allocation19 + $0x20] sm:$0xff] }
 0x767   : > { %1677 = vmatpush.bf16.msra.mxu1 %v2506_v11 }
 0x768   : > { %1665 = vmatpush.bf16.msrb.mxu0 %v2470_v22  ;;  %v2785_v22 = vld [vmem:[#allocation19 + $0x60] sm:$0xff] }
 0x76a   : > { %1652 = vmatpush.bf16.msra.mxu3 %v2450_v33  ;;  %v2797_v33 = vld [vmem:[#allocation19 + $0xc0] sm:$0xff] }
 0x76b   : > { %1678 = vmatpush.bf16.msra.mxu1 %v2490_v10  ;;  %v2779_v10 = vld [vmem:[#allocation19 + $0x30] sm:$0xff] }
 0x76c   : > { %1666 = vmatpush.bf16.msrb.mxu0 %v2454_v37  ;;  %v2782_v37 = vld [vmem:[#allocation19 + $0x48] sm:$0xff] }
 0x76e   : > { %2037 = vmatpush.bf16.msrb.mxu3 %v2788_v6 }
 0x76f   : > { %1679 = vmatpush.bf16.msra.mxu1 %v2474_v27  ;;  %v2790_v27 = vld [vmem:[#allocation19 + $0x88] sm:$0xff] }
 0x772   : > { %2038 = vmatpush.bf16.msrb.mxu3 %v2787_v12 }
 0x773   : > { %1680 = vmatpush.bf16.msra.mxu1 %v2458_v40 }
 0x776   : > { %2039 = vmatpush.bf16.msrb.mxu3 %v2786_v17 }
 0x777   : > { %2065 = vmatpush.bf16.msrb.mxu1 %v2804_v3 }
 0x77a   : > { %2040 = vmatpush.bf16.msrb.mxu3 %v2785_v22 }
 0x77b   : > { %2066 = vmatpush.bf16.msrb.mxu1 %v2803_v5 }
 0x77f   : > { %2067 = vmatpush.bf16.msrb.mxu1 %v2802_v9 }
 0x783   : > { %2068 = vmatpush.bf16.msrb.mxu1 %v2801_v14 }
 0x787   : > { %2069 = vmatpush.bf16.msrb.mxu1 %v2800_v19 }
 0x78b   : > { %2070 = vmatpush.bf16.msrb.mxu1 %v2799_v24 }
 0x78f   : > { %2071 = vmatpush.bf16.msrb.mxu1 %v2798_v28 }
 0x793   : > { %2072 = vmatpush.bf16.msrb.mxu1 %v2797_v33 }
 0x7cf   : > { %v1389_v26 = vpop.xlane.xlu2 %1388 }
 0x7d0   : > { %v1392_v31 = vmul.f32 %v1389_v26, %v3708_v8  ;;  %v2784_v26 = vld [vmem:[#allocation19 + $0x58] sm:$0xff] }
 0x7d1   : > { %2041 = vmatpush.bf16.msrb.mxu3 %v2784_v26 }
 0x7d2   : > { %v1394_v39 = vadd.f32 1e-06, %v1392_v31  ;;  %v2783_v31 = vld [vmem:[#allocation19 + $0x50] sm:$0xff] }
 0x7d4   : > { %3018 = vrsqrt.f32 %v1394_v39  ;;  %vm1402_vm12 = vweird.f32 %v1394_v39 }
 0x7d5   : > { %2042 = vmatpush.bf16.msrb.mxu3 %v2783_v31 }
 0x7d7   : > { %v1391_v41 = vpop.xlane.xlu0 %1390 }
 0x7d8   : > { %v1393_v42 = vmul.f32 %v1391_v41, %v3708_v8 }
 0x7d9   : > { %2043 = vmatpush.bf16.msrb.mxu3 %v2782_v37 }
 0x7da   : > { %v3019_v43 = vpop.eup %3018  ;;  %v1395_v44 = vadd.f32 1e-06, %v1393_v42  ;;  %v1463_v42 = vperm.slane %v3815_v29, 0 }
 0x7db   : > { %v1397_v45 = vmul.f32 %v3019_v43, %v1394_v39  ;;  %vm1403_vm11 = vweird.f32 %v3019_v43 }
 0x7dc   : > { %3020 = vrsqrt.f32 %v1395_v44  ;;  %vm1404_vm13 = vmor %vm1402_vm12, %vm1403_vm11  ;;  %vm1412_vm15 = vweird.f32 %v1395_v44 }
 0x7dd   : > { %v1398_v46 = vmul.f32 %v3019_v43, %v1397_v45 }
 0x7df   : > { %v1399_v47 = vmul.f32 0.5, %v1398_v46  ;;  %v2773_v46 = vld [vmem:[#allocation19] sm:$0xff] }
 0x7e1   : > { %v1400_v48 = vsub.f32 1.5, %v1399_v47  ;;  %v2781_v47 = vld [vmem:[#allocation19 + $0x40] sm:$0xff] }
 0x7e2   : > { %v3021_v49 = vpop.eup %3020  ;;  %2044 = vmatpush.bf16.msrb.mxu3 %v2781_v47 }
 0x7e3   : > { %v1401_v55 = vmul.f32 %v3019_v43, %v1400_v48  ;;  %v1407_v57 = vmul.f32 %v3021_v49, %v1395_v44  ;;  %vm1413_vm14 = vweird.f32 %v3021_v49 }
 0x7e4   : > { %vm1414_vm0 = vmor %vm1412_vm15, %vm1413_vm14 }
 0x7e5   : > { %v1408_v50 = vmul.f32 %v3021_v49, %v1407_v57  ;;  %v1405_v51 = vsel %vm1404_vm13, %v3019_v43, %v1401_v55  ;;  %v1464_v43 = vperm.slane %v3815_v29, 1 }
 0x7e6   : > { %v1416_v8 = vmul.f32 %v1405_v51, %v3795_v54  ;;  %v2796_v54 = vld [vmem:[#allocation19 + $0xb8] sm:$0xff] }
 0x7e7   : > { %v1409_v52 = vmul.f32 0.5, %v1408_v50  ;;  %2051 = vmatpush.bf16.msra.mxu0 %v2796_v54 }
 0x7e8   : > { %v1421_v11 = vmul.f32 %v2976_v0, %v1416_v8 }
 0x7e9   : > { %v1410_v53 = vsub.f32 1.5, %v1409_v52 }
 0x7ea   : > { %v1426_v63 = vadd.f32 %v2977_v61, %v1421_v11 }
 0x7eb   : > { %v1411_v58 = vmul.f32 %v3021_v49, %v1410_v53  ;;  %2052 = vmatpush.bf16.msra.mxu0 %v2795_v4 }
 0x7ed   : > { %v1415_v59 = vsel %vm1414_vm0, %v3021_v49, %v1411_v58 }
 0x7ee   : > { %v1417_v1 = vmul.f32 %v1415_v59, %v3801_v60  ;;  %v2780_v60 = vld [vmem:[#allocation19 + $0x38] sm:$0xff] }
 0x7ef   : > { %2023 = vmatpush.bf16.msra.mxu2 %v2780_v60  ;;  %2053 = vmatpush.bf16.msra.mxu0 %v2794_v7 }
 0x7f0   : > { %v1422_v62 = vmul.f32 %v2976_v0, %v1417_v1 }
 0x7f2   : > { %v1427_v2 = vadd.f32 %v2977_v61, %v1422_v62 }
 0x7f3   : > { %2024 = vmatpush.bf16.msra.mxu2 %v2779_v10  ;;  %2054 = vmatpush.bf16.msra.mxu0 %v2793_v13 }
 0x7f4   : > { %v1428_v15 = vpack.c.bf16 %v1427_v2, %v1426_v63 }
 0x7f6   : > { %1639 = vmatmul.bf16.vlgmr.msrb.gmra.mxu2 %v1428_v15  ;;  %1653 = vmatmul.bf16.vlgmr.msra.gmra.mxu3 %v1428_v15 }
 0x7f7   : > { %1667 = vmatmul.bf16.vlgmr.msrb.gmra.mxu0 %v1428_v15  ;;  %1681 = vmatmul.bf16.vlgmr.msra.gmra.mxu1 %v1428_v15 }
 0x7f8   : > { %2025 = vmatpush.bf16.msra.mxu2 %v2778_v16  ;;  %2055 = vmatpush.bf16.msra.mxu0 %v2792_v18 }
 0x7fc   : > { %2026 = vmatpush.bf16.msra.mxu2 %v2777_v21  ;;  %2056 = vmatpush.bf16.msra.mxu0 %v2791_v23 }
 0x800   : > { %2027 = vmatpush.bf16.msra.mxu2 %v2776_v25  ;;  %2057 = vmatpush.bf16.msra.mxu0 %v2790_v27 }
 0x804   : > { %2028 = vmatpush.bf16.msra.mxu2 %v2775_v30  ;;  %2058 = vmatpush.bf16.msra.mxu0 %v2789_v32 }
 0x808   : > { %2029 = vmatpush.bf16.msra.mxu2 %v2774_v36 }
 0x80c   : > { %2030 = vmatpush.bf16.msra.mxu2 %v2773_v46 }
 0x874   : > { %v1668_v38 = vpop.f32.mrf.mxu0  ;;  %v1682_v39 = vpop.f32.mrf.mxu1 }
 0x875   : > { %v3819_v40 = vadd.f32 %v1668_v38, %v1465_v34  ;;  %v3821_v41 = vadd.f32 %v1682_v39, %v1466_v35 }
 0x877   : > { %v1697_v44 = vmul.f32 0.044715, %v3819_v40  ;;  %v1698_v45 = vmul.f32 0.044715, %v3821_v41 }
 0x879   : > { %v1705_v48 = vmul.f32 %v1697_v44, %v3819_v40  ;;  %v1706_v49 = vmul.f32 %v1698_v45, %v3821_v41  ;;  %v1640_v55 = vpop.f32.mrf.mxu2  ;;  %v1654_v57 = vpop.f32.mrf.mxu3  ;;  %v1689_v45 = vmul.f32 0.5, %v3819_v40 }
 0x87a   : > { %v3829_v50 = vadd.f32 %v1640_v55, %v1463_v42  ;;  %v3831_v51 = vadd.f32 %v1654_v57, %v1464_v43 }
 0x87b   : > { %v1713_v52 = vmul.f32 %v1705_v48, %v3819_v40  ;;  %v1714_v53 = vmul.f32 %v1706_v49, %v3821_v41  ;;  %v1690_v49 = vmul.f32 0.5, %v3821_v41 }
 0x87c   : > { %v1695_v8 = vmul.f32 0.044715, %v3829_v50  ;;  %v1696_v0 = vmul.f32 0.044715, %v3831_v51  ;;  %v1670_v58 = vpop.f32.mrf.mxu0  ;;  %v1684_v59 = vpop.f32.mrf.mxu1 }
 0x87d   : > { %v1721_v1 = vadd.f32 %v1713_v52, %v3819_v40  ;;  %v1671_v11 = vadd.f32 %v1670_v58, %v1465_v34  ;;  %v1685_v61 = vadd.f32 %v1684_v59, %v1466_v35  ;;  %v1722_v62 = vadd.f32 %v1714_v53, %v3821_v41 }
 0x87e   : > { %v1703_v63 = vmul.f32 %v1695_v8, %v3829_v50  ;;  %v1704_v2 = vmul.f32 %v1696_v0, %v3831_v51 }
 0x87f   : > { %v1701_v15 = vmul.f32 0.044715, %v1671_v11  ;;  %v1702_v4 = vmul.f32 0.044715, %v1685_v61  ;;  %v1729_v5 = vmul.f32 0.7978845, %v1721_v1 }
 0x880   : > { %v1711_v54 = vmul.f32 %v1703_v63, %v3829_v50  ;;  %v1712_v3 = vmul.f32 %v1704_v2, %v3831_v51  ;;  %v1730_v9 = vmul.f32 0.7978845, %v1722_v62  ;;  %v1693_v46 = vmul.f32 0.5, %v1671_v11 }
 0x881   : > { %v1709_v60 = vmul.f32 %v1701_v15, %v1671_v11  ;;  %v1642_v6 = vpop.f32.mrf.mxu2  ;;  %v1656_v7 = vpop.f32.mrf.mxu3  ;;  %v1710_v12 = vmul.f32 %v1702_v4, %v1685_v61  ;;  %3022 = vtanh.f32 %v1729_v5  ;;  %v1694_v55 = vmul.f32 0.5, %v1685_v61 }
 0x882   : > { %v1719_v10 = vadd.f32 %v1711_v54, %v3829_v50  ;;  %v1643_v13 = vadd.f32 %v1642_v6, %v1463_v42  ;;  %v1720_v14 = vadd.f32 %v1712_v3, %v3831_v51  ;;  %v1657_v17 = vadd.f32 %v1656_v7, %v1464_v43 }
 0x883   : > { %v1717_v16 = vmul.f32 %v1709_v60, %v1671_v11  ;;  %v1718_v19 = vmul.f32 %v1710_v12, %v1685_v61  ;;  %3024 = vtanh.f32 %v1730_v9  ;;  %v1687_v15 = vmul.f32 0.5, %v3829_v50  ;;  %v2978_v50 = vld [vmem:[%s3933_s14] ss:$0 sm:$0xff] }
 0x884   : > { %v1727_v18 = vmul.f32 0.7978845, %v1719_v10  ;;  %v1699_v21 = vmul.f32 0.044715, %v1643_v13  ;;  %v1700_v23 = vmul.f32 0.044715, %v1657_v17 }
 0x885   : > { %v1725_v22 = vadd.f32 %v1717_v16, %v1671_v11  ;;  %v1726_v24 = vadd.f32 %v1718_v19, %v1685_v61  ;;  %v1728_v26 = vmul.f32 0.7978845, %v1720_v14  ;;  %v1691_v40 = vmul.f32 0.5, %v1643_v13 }
 0x886   : > { %v1707_v25 = vmul.f32 %v1699_v21, %v1643_v13  ;;  %v1708_v28 = vmul.f32 %v1700_v23, %v1657_v17  ;;  %3026 = vtanh.f32 %v1727_v18  ;;  %v1688_v54 = vmul.f32 0.5, %v3831_v51 }
 0x887   : > { %v1733_v27 = vmul.f32 0.7978845, %v1725_v22  ;;  %v1734_v29 = vmul.f32 0.7978845, %v1726_v24  ;;  %v3023_v33 = vpop.eup %3022  ;;  %v1692_v41 = vmul.f32 0.5, %v1657_v17 }
 0x888   : > { %v1715_v30 = vmul.f32 %v1707_v25, %v1643_v13  ;;  %v1716_v31 = vmul.f32 %v1708_v28, %v1657_v17  ;;  %v1745_v39 = vadd.f32 1.0, %v3023_v33 }
 0x889   : > { %3028 = vtanh.f32 %v1733_v27  ;;  %v3025_v35 = vpop.eup %3024 }
 0x88a   : > { %v1723_v32 = vadd.f32 %v1715_v30, %v1643_v13  ;;  %3030 = vtanh.f32 %v1734_v29  ;;  %v1724_v34 = vadd.f32 %v1716_v31, %v1657_v17  ;;  %v1746_v43 = vadd.f32 1.0, %v3025_v35  ;;  %v2979_v17 = vld [vmem:[%s3934_s17] ss:$0 sm:$0xff] }
 0x88b   : > { %3032 = vtanh.f32 %v1728_v26  ;;  %v1753_v52 = vmul.f32 %v1745_v39, %v1689_v45 }
 0x88c   : > { %v1731_v36 = vmul.f32 0.7978845, %v1723_v32  ;;  %v1732_v37 = vmul.f32 0.7978845, %v1724_v34  ;;  %v3027_v38 = vpop.eup %3026  ;;  %v1754_v8 = vmul.f32 %v1746_v43, %v1690_v49 }
 0x88d   : > { %v1743_v58 = vadd.f32 1.0, %v3027_v38 }
 0x88e   : > { %3034 = vtanh.f32 %v1731_v36 }
 0x88f   : > { %v3029_v42 = vpop.eup %3028  ;;  %3036 = vtanh.f32 %v1732_v37  ;;  %v1751_v3 = vmul.f32 %v1743_v58, %v1687_v15 }
 0x890   : > { %v3031_v44 = vpop.eup %3030  ;;  %v1749_v47 = vadd.f32 1.0, %v3029_v42 }
 0x891   : > { %v3033_v48 = vpop.eup %3032  ;;  %v1750_v57 = vadd.f32 1.0, %v3031_v44 }
 0x892   : > { %v1757_v53 = vmul.f32 %v1749_v47, %v1693_v46  ;;  %v1744_v62 = vadd.f32 1.0, %v3033_v48 }
 0x893   : > { %v1758_v0 = vmul.f32 %v1750_v57, %v1694_v55 }
 0x894   : > { %v3035_v59 = vpop.eup %3034  ;;  %v1761_v1 = vpack.c.bf16 %v1757_v53, %v1753_v52  ;;  %v1752_v5 = vmul.f32 %v1744_v62, %v1688_v54 }
 0x895   : > { %v3037_v63 = vpop.eup %3036  ;;  %v1762_v2 = vpack.c.bf16 %v1758_v0, %v1754_v8  ;;  %v1747_v11 = vadd.f32 1.0, %v3035_v59 }
 0x896   : > { %2059 = vmatmul.bf16.vlgmr.msra.gmra.mxu0 %v1761_v1  ;;  %v1748_v61 = vadd.f32 1.0, %v3037_v63 }
 0x897   : > { %2073 = vmatmul.bf16.vlgmr.msrb.gmra.mxu1 %v1762_v2  ;;  %v1755_v4 = vmul.f32 %v1747_v11, %v1691_v40 }
 0x898   : > { %v1756_v60 = vmul.f32 %v1748_v61, %v1692_v41 }
 0x899   : > { %v1759_v6 = vpack.c.bf16 %v1755_v4, %v1751_v3 }
 0x89a   : > { %v1760_v7 = vpack.c.bf16 %v1756_v60, %v1752_v5 }
 0x89b   : > { %2031 = vmatmul.bf16.vlgmr.msra.gmra.mxu2 %v1759_v6 }
 0x89c   : > { %2045 = vmatmul.bf16.vlgmr.msrb.gmra.mxu3 %v1760_v7 }
 0x913   : > { %v2060_v51 = vpop.f32.mrf.mxu0 }
 0x914   : > { %v2074_v14 = vpop.f32.mrf.mxu1 }
 0x91b   : > { %v2062_v26 = vpop.f32.mrf.mxu0 }
 0x91c   : > { %v2076_v28 = vpop.f32.mrf.mxu1 }
 0x91e   : > { %v2032_v9 = vpop.f32.mrf.mxu2 }
 0x91f   : > { %v2033_v10 = vadd.f32 %v2978_v50, %v2032_v9  ;;  %v2046_v12 = vpop.f32.mrf.mxu3 }
 0x921   : > { %v2047_v13 = vadd.f32 %v2046_v12, %v2033_v10 }
 0x923   : > { %v2061_v16 = vadd.f32 %v2060_v51, %v2047_v13 }
 0x925   : > { %v2075_v18 = vadd.f32 %v2074_v14, %v2061_v16 }
 0x926   : > { %v2034_v19 = vpop.f32.mrf.mxu2 }
 0x927   : > { %v2083_v21 = vmul.f32 %v2979_v17, %v2075_v18  ;;  %v2035_v22 = vadd.f32 %v2978_v50, %v2034_v19  ;;  %v2048_v23 = vpop.f32.mrf.mxu3 }
 0x929   : > { %v2085_v24 = vadd.f32 %v2083_v21, %v3786_v56  ;;  %v2049_v25 = vadd.f32 %v2048_v23, %v2035_v22 }
 0x92b   : > { %2087 = vst [vmem:[%s653_s22] sm:$0xff] %v2085_v24  ;;  %v2063_v27 = vadd.f32 %v2062_v26, %v2049_v25 }
 0x92d   : > { %v2077_v29 = vadd.f32 %v2076_v28, %v2063_v27 }
 0x92f   : > { %v2084_v30 = vmul.f32 %v2979_v17, %v2077_v29 }
 0x931   : > { %v2086_v56 = vadd.f32 %v2084_v30, %v3790_v20 }
 0x933   : > { %2088 = vst [vmem:[%s653_s22 + $0x8] sm:$0xff] %v2086_v56 }
 0x934   : > { %3365 = shalt.err (!%p3362_p9)
}
 0x935   : > { %s3447_s23 = smov 128   ;;  %s3448_s28 = smov 8  }
 0x936   : > { %2859 = dma.vmem_to_hbm [thread:$0]  (%p3639_p0), %s2103_s11, 256, %s2105_s29, %s2090_s25, %s3447_s23, %s3447_s23, %s3448_s28  }
 0x937 PF: > { %s2119_s16 = sand.u32 1, %s3412_s18   ;;  %p3936_p10 = scmp.ge.s32.totalorder %s3424_s21, 2 }
 0x938   : > { %s2120_s1 = scalar_lea.sflag [#allocation6], %s2119_s16 }
 0x939   : > { %p2894_p11 = pnand %p3936_p10, %p3645_p6 }
 0x93b   : > { %p2895_p12 = pneg %p2894_p11 }
 0x93d   : > { %3407 = dma.done.wait (%p2895_p12), %s2120_s1, 256  }
 0x93e   : > { %3409 = vsyncadd (%p2895_p12), %s2120_s1, 4294967040  ;;  %p33_p2 = scmp.ge.s32.totalorder %s3615_s15, 4   ;;  %s3937_s18 = smov %s3416_s19 }
 0x93f   : > { %s3938_s19 = smov %s3420_s20  ;;  %s3939_s20 = smov %s3627_s27 }
 0x940   : > { %s3940_s21 = smov %s3615_s15  ;;  %35 = sbr.rel (!%p33_p2) target bundleno = 21 (0x15), region = 163 }
 0x945   :  { %2126 = vsyncpa [#allocation5], 1 }
 0x946   :  { %2128 = vsyncpa [#allocation5 + $0x1], 1 }
 0x947   :  { %2129 = vsyncpa [#allocation8], 1 }
 0x948   :  { %2130 = vsyncpa [#allocation11], 1 }
 0x949   :  { %2131 = vsyncpa [#allocation14], 1 }
 0x94a   :  { %2132 = vsyncpa [#allocation17], 1 }
 0x94b   :  { %2133 = vsyncpa [#allocation20], 1 }
 0x94c   :  { %2134 = vsyncpa [#allocation6], 1 }
 0x94d   :  { %2136 = vsyncpa [#allocation6 + $0x1], 1 }

</bundles_post_ra>
